<compile_context>
chip_gen: v6e
topology: v6e:2x2x1
jax: 0.10.0
libtpu: 0.0.40
codegen_flags: <defaults>
</compile_context>

<pallas_src>
import math
import functools

import jax
import jax.numpy as jnp
from jax.experimental import pallas as pl
from jax.experimental.pallas import tpu as pltpu

NEG_INF = -1e30            # additive mask value (caller guarantees >=1 unmasked key/row)
_VMEM_LIMIT = 48 * 1024 * 1024


# ------------------------------- helpers ----------------------------------- #

def _row_tile(rows):
    """Largest row tile (multiple of 8) that divides `rows`, capped at 512."""
    for t in (512, 256, 128, 64, 32, 16, 8):
        if rows % t == 0:
            return t
    return rows  # single full-rows block (equals full array dim)


def _layer_norm(x, gamma, beta, eps):
    """f32 LayerNorm statistics; gamma/beta are (1, E)."""
    mean = jnp.mean(x, axis=-1, keepdims=True)
    xc = x - mean
    var = jnp.mean(xc * xc, axis=-1, keepdims=True)
    return xc * jax.lax.rsqrt(var + eps) * gamma + beta


def _attention_core(q, k, v, bias, *, num_heads, scale):
    """Batched multi-head attention: q (S,E), k/v (T,E) f32, bias (S,T) f32 -> (S,E) f32."""
    S, E = q.shape
    Dh = E // num_heads
    # (H, S, Dh) / (H, T, Dh): leading-batch layout, built from cheap minor-dim slices
    # stacked along a new (free) major axis.
    qh = jnp.stack([q[:, h * Dh:(h + 1) * Dh] for h in range(num_heads)],
                   axis=0).astype(jnp.bfloat16)
    kh = jnp.stack([k[:, h * Dh:(h + 1) * Dh] for h in range(num_heads)],
                   axis=0).astype(jnp.bfloat16)
    vh = jnp.stack([v[:, h * Dh:(h + 1) * Dh] for h in range(num_heads)],
                   axis=0).astype(jnp.bfloat16)
    # scores for all heads in one batched dot_general (f32 accumulation)
    s = jax.lax.dot_general(qh, kh, (((2,), (2,)), ((0,), (0,))),
                            preferred_element_type=jnp.float32)          # (H, S, T)
    s = s * scale + bias[None, :, :]
    m = jnp.max(s, axis=-1, keepdims=True)
    p = jnp.exp(s - m)
    p = p * pl.reciprocal(jnp.sum(p, axis=-1, keepdims=True), approx=True)
    o = jax.lax.dot_general(p.astype(jnp.bfloat16), vh, (((2,), (1,)), ((0,), (0,))),
                            preferred_element_type=jnp.float32)          # (H, S, Dh)
    # merge heads along the lane dim -> single full-width out-projection by the caller
    return jnp.concatenate([o[h] for h in range(num_heads)], axis=-1)    # (S, E) f32


# ----------------------------- Pallas kernels ------------------------------ #

def _self_attn_kernel(x_ref, kmask_ref, g_ref, b_ref, wqkv_ref, bqkv_ref,
                      wo_ref, bo_ref, o_ref, *, num_heads, scale, eps):
    """Fused pre-LN self-attention block with residual, one batch element per step."""
    x = x_ref[0].astype(jnp.float32)                                     # (S, E)
    S, E = x.shape
    h = _layer_norm(x, g_ref[...], b_ref[...], eps)
    # packed QKV projection: one full-width MXU matmul
    qkv = jnp.dot(h.astype(jnp.bfloat16), wqkv_ref[...],
                  preferred_element_type=jnp.float32) + bqkv_ref[...]    # (S, 3E)
    q = qkv[:, :E]
    k = qkv[:, E:2 * E]
    v = qkv[:, 2 * E:]
    # additive bias (key padding + causal), built in-kernel, broadcast hoisted once
    kb = jnp.where(kmask_ref[0] > 0.5, 0.0, NEG_INF)                     # (1, S)
    bias = jnp.broadcast_to(kb, (S, S))
    row = jax.lax.broadcasted_iota(jnp.int32, (S, S), 0)
    col = jax.lax.broadcasted_iota(jnp.int32, (S, S), 1)
    bias = bias + jnp.where(col > row, NEG_INF, 0.0)
    ctx = _attention_core(q, k, v, bias, num_heads=num_heads, scale=scale)
    out = x + jnp.dot(ctx.astype(jnp.bfloat16), wo_ref[...],
                      preferred_element_type=jnp.float32) + bo_ref[...]
    o_ref[0] = out.astype(o_ref.dtype)


def _cross_attn_kernel(x_ref, mem_ref, kmask_ref, g_ref, b_ref, wq_ref, bq_ref,
                       wkv_ref, bkv_ref, wo_ref, bo_ref, o_ref,
                       *, num_heads, scale, eps):
    """Fused pre-LN cross-attention block with residual, one batch element per step."""
    x = x_ref[0].astype(jnp.float32)                                     # (S, E)
    mem = mem_ref[0].astype(jnp.float32)                                 # (T, E)
    S, E = x.shape
    T = mem.shape[0]
    h = _layer_norm(x, g_ref[...], b_ref[...], eps)
    q = jnp.dot(h.astype(jnp.bfloat16), wq_ref[...],
                preferred_element_type=jnp.float32) + bq_ref[...]        # (S, E)
    kv = jnp.dot(mem.astype(jnp.bfloat16), wkv_ref[...],
                 preferred_element_type=jnp.float32) + bkv_ref[...]      # (T, 2E)
    k = kv[:, :E]
    v = kv[:, E:]
    kb = jnp.where(kmask_ref[0] > 0.5, 0.0, NEG_INF)                     # (1, T)
    bias = jnp.broadcast_to(kb, (S, T))
    ctx = _attention_core(q, k, v, bias, num_heads=num_heads, scale=scale)
    out = x + jnp.dot(ctx.astype(jnp.bfloat16), wo_ref[...],
                      preferred_element_type=jnp.float32) + bo_ref[...]
    o_ref[0] = out.astype(o_ref.dtype)


def _ffn_kernel(x_ref, g_ref, b_ref, w1_ref, b1_ref, w2_ref, b2_ref, o_ref, *, eps):
    """Fused pre-LN feed-forward block with residual: o = x + W2(relu(W1(LN(x))))."""
    x = x_ref[...].astype(jnp.float32)                                   # (TM, E)
    h = _layer_norm(x, g_ref[...], b_ref[...], eps)
    h = jnp.dot(h.astype(jnp.bfloat16), w1_ref[...],
                preferred_element_type=jnp.float32) + b1_ref[...]
    h = jnp.maximum(h, 0.0)
    y = jnp.dot(h.astype(jnp.bfloat16), w2_ref[...],
                preferred_element_type=jnp.float32) + b2_ref[...]
    o_ref[...] = (x + y).astype(o_ref.dtype)


def _head_kernel(x_ref, w_ref, b_ref, o_ref):
    """Fused logit projection + log_softmax over the vocab (f32 statistics/output)."""
    logits = jnp.dot(x_ref[...].astype(jnp.bfloat16), w_ref[...],
                     preferred_element_type=jnp.float32) + b_ref[...]
    m = jnp.max(logits, axis=-1, keepdims=True)
    shifted = logits - m
    lse = jnp.log(jnp.sum(jnp.exp(shifted), axis=-1, keepdims=True))
    o_ref[...] = (shifted - lse).astype(o_ref.dtype)


# --------------------------- pallas_call wrappers --------------------------- #

def self_attn_block(x, key_mask, gamma, beta, wqkv, bqkv, wo, bo, *, num_heads, eps=1e-5):
    B, S, E = x.shape
    Dh = E // num_heads
    kern = functools.partial(_self_attn_kernel, num_heads=num_heads,
                             scale=1.0 / math.sqrt(Dh), eps=eps)
    return pl.pallas_call(
        kern,
        out_shape=jax.ShapeDtypeStruct((B, S, E), x.dtype),
        grid=(B,),
        in_specs=[
            pl.BlockSpec((1, S, E), lambda b: (b, 0, 0)),
            pl.BlockSpec((1, 1, S), lambda b: (b, 0, 0)),
            pl.BlockSpec((1, E), lambda b: (0, 0)),
            pl.BlockSpec((1, E), lambda b: (0, 0)),
            pl.BlockSpec((E, 3 * E), lambda b: (0, 0)),
            pl.BlockSpec((1, 3 * E), lambda b: (0, 0)),
            pl.BlockSpec((E, E), lambda b: (0, 0)),
            pl.BlockSpec((1, E), lambda b: (0, 0)),
        ],
        out_specs=pl.BlockSpec((1, S, E), lambda b: (b, 0, 0)),
        compiler_params=pltpu.CompilerParams(
            dimension_semantics=("parallel",), vmem_limit_bytes=_VMEM_LIMIT),
        cost_estimate=pl.CostEstimate(
            flops=B * (6 * S * E * E + 4 * S * S * E + 2 * S * E * E),
            transcendentals=B * num_heads * S * S,
            bytes_accessed=4 * B * S * E + 8 * E * E),
    )(x, key_mask, gamma.reshape(1, E), beta.reshape(1, E),
      wqkv, bqkv.reshape(1, 3 * E), wo, bo.reshape(1, E))


def cross_attn_block(x, memory, key_mask, gamma, beta, wq, bq, wkv, bkv, wo, bo,
                     *, num_heads, eps=1e-5):
    B, S, E = x.shape
    T = memory.shape[1]
    Dh = E // num_heads
    kern = functools.partial(_cross_attn_kernel, num_heads=num_heads,
                             scale=1.0 / math.sqrt(Dh), eps=eps)
    return pl.pallas_call(
        kern,
        out_shape=jax.ShapeDtypeStruct((B, S, E), x.dtype),
        grid=(B,),
        in_specs=[
            pl.BlockSpec((1, S, E), lambda b: (b, 0, 0)),
            pl.BlockSpec((1, T, E), lambda b: (b, 0, 0)),
            pl.BlockSpec((1, 1, T), lambda b: (b, 0, 0)),
            pl.BlockSpec((1, E), lambda b: (0, 0)),
            pl.BlockSpec((1, E), lambda b: (0, 0)),
            pl.BlockSpec((E, E), lambda b: (0, 0)),
            pl.BlockSpec((1, E), lambda b: (0, 0)),
            pl.BlockSpec((E, 2 * E), lambda b: (0, 0)),
            pl.BlockSpec((1, 2 * E), lambda b: (0, 0)),
            pl.BlockSpec((E, E), lambda b: (0, 0)),
            pl.BlockSpec((1, E), lambda b: (0, 0)),
        ],
        out_specs=pl.BlockSpec((1, S, E), lambda b: (b, 0, 0)),
        compiler_params=pltpu.CompilerParams(
            dimension_semantics=("parallel",), vmem_limit_bytes=_VMEM_LIMIT),
        cost_estimate=pl.CostEstimate(
            flops=B * (2 * S * E * E + 4 * T * E * E + 4 * S * T * E + 2 * S * E * E),
            transcendentals=B * num_heads * S * T,
            bytes_accessed=2 * B * (2 * S * E + T * E) + 8 * E * E),
    )(x, memory, key_mask, gamma.reshape(1, E), beta.reshape(1, E),
      wq, bq.reshape(1, E), wkv, bkv.reshape(1, 2 * E), wo, bo.reshape(1, E))


def ffn_block(x, gamma, beta, w1, b1, w2, b2, *, eps=1e-5):
    shp = x.shape
    E = shp[-1]
    x2 = x.reshape(-1, E)
    rows = x2.shape[0]
    F = w1.shape[1]
    tm = _row_tile(rows)
    out = pl.pallas_call(
        functools.partial(_ffn_kernel, eps=eps),
        out_shape=jax.ShapeDtypeStruct((rows, E), x.dtype),
        grid=(rows // tm,),
        in_specs=[
            pl.BlockSpec((tm, E), lambda i: (i, 0)),
            pl.BlockSpec((1, E), lambda i: (0, 0)),
            pl.BlockSpec((1, E), lambda i: (0, 0)),
            pl.BlockSpec((E, F), lambda i: (0, 0)),
            pl.BlockSpec((1, F), lambda i: (0, 0)),
            pl.BlockSpec((F, E), lambda i: (0, 0)),
            pl.BlockSpec((1, E), lambda i: (0, 0)),
        ],
        out_specs=pl.BlockSpec((tm, E), lambda i: (i, 0)),
        compiler_params=pltpu.CompilerParams(
            dimension_semantics=("parallel",), vmem_limit_bytes=_VMEM_LIMIT),
        cost_estimate=pl.CostEstimate(
            flops=4 * rows * E * F, transcendentals=0,
            bytes_accessed=4 * rows * E + 4 * E * F),
    )(x2, gamma.reshape(1, E), beta.reshape(1, E),
      w1, b1.reshape(1, F), w2, b2.reshape(1, E))
    return out.reshape(shp)


def head_block(x, w, b):
    B, S, E = x.shape
    V = w.shape[1]
    rows = B * S
    tm = _row_tile(rows)
    out = pl.pallas_call(
        _head_kernel,
        out_shape=jax.ShapeDtypeStruct((rows, V), jnp.float32),
        grid=(rows // tm,),
        in_specs=[
            pl.BlockSpec((tm, E), lambda i: (i, 0)),
            pl.BlockSpec((E, V), lambda i: (0, 0)),
            pl.BlockSpec((1, V), lambda i: (0, 0)),
        ],
        out_specs=pl.BlockSpec((tm, V), lambda i: (i, 0)),
        compiler_params=pltpu.CompilerParams(
            dimension_semantics=("parallel",), vmem_limit_bytes=_VMEM_LIMIT),
        cost_estimate=pl.CostEstimate(
            flops=2 * rows * E * V, transcendentals=rows * V,
            bytes_accessed=2 * rows * E + 2 * E * V + 4 * rows * V),
    )(x.reshape(rows, E), w, b.reshape(1, V))
    return out.reshape(B, S, V)


# ------------------------------ model pieces ------------------------------- #

def decoder_layer(x, memory, p, inputs_kmask, context_kmask, num_heads):
    # norm_first=True TransformerDecoderLayer, eval mode (no dropout).
    x = self_attn_block(x, inputs_kmask, p["norm1_w"], p["norm1_b"],
                        p["sa_wqkv"], p["sa_bqkv"], p["sa_wo"], p["sa_bo"],
                        num_heads=num_heads)
    x = cross_attn_block(x, memory, context_kmask, p["norm2_w"], p["norm2_b"],
                         p["ca_wq"], p["ca_bq"], p["ca_wkv"], p["ca_bkv"],
                         p["ca_wo"], p["ca_bo"], num_heads=num_heads)
    x = ffn_block(x, p["norm3_w"], p["norm3_b"],
                  p["ff_w1"], p["ff_b1"], p["ff_w2"], p["ff_b2"])
    return x


def make_positional_encoding(max_len, d_model):
    position = jnp.arange(max_len, dtype=jnp.float32)[:, None]
    div_term = jnp.exp(jnp.arange(0, d_model, 2, dtype=jnp.float32)
                       * (-math.log(10000.0) / d_model))
    pe = jnp.zeros((max_len, d_model), jnp.float32)
    pe = pe.at[:, 0::2].set(jnp.sin(position * div_term))
    pe = pe.at[:, 1::2].set(jnp.cos(position * div_term))
    return pe


def init_params(key, max_len, num_tokens, num_layers, hidden_dim):
    E = hidden_dim

    def dense(k, fan_in, fan_out):
        # Weights stored in bf16 for the MXU path (accumulation stays f32 in-kernel).
        return (0.02 * jax.random.normal(k, (fan_in, fan_out), jnp.float32)).astype(jnp.bfloat16)

    keys = jax.random.split(key, 2 + num_layers)
    params = {
        "embedding": 0.02 * jax.random.normal(keys[0], (num_tokens, E), jnp.float32),
        "logit_w": dense(keys[1], E, num_tokens),
        "logit_b": jnp.zeros((num_tokens,), jnp.float32),
        "pe": make_positional_encoding(max_len, E),
        "layers": [],
    }
    for l in range(num_layers):
        lk = jax.random.split(keys[2 + l], 7)
        params["layers"].append(dict(
            sa_wqkv=dense(lk[0], E, 3 * E), sa_bqkv=jnp.zeros((3 * E,), jnp.float32),
            sa_wo=dense(lk[1], E, E), sa_bo=jnp.zeros((E,), jnp.float32),
            ca_wq=dense(lk[2], E, E), ca_bq=jnp.zeros((E,), jnp.float32),
            ca_wkv=dense(lk[3], E, 2 * E), ca_bkv=jnp.zeros((2 * E,), jnp.float32),
            ca_wo=dense(lk[4], E, E), ca_bo=jnp.zeros((E,), jnp.float32),
            ff_w1=dense(lk[5], E, 4 * E), ff_b1=jnp.zeros((4 * E,), jnp.float32),
            ff_w2=dense(lk[6], 4 * E, E), ff_b2=jnp.zeros((E,), jnp.float32),
            norm1_w=jnp.ones((E,), jnp.float32), norm1_b=jnp.zeros((E,), jnp.float32),
            norm2_w=jnp.ones((E,), jnp.float32), norm2_b=jnp.zeros((E,), jnp.float32),
            norm3_w=jnp.ones((E,), jnp.float32), norm3_b=jnp.zeros((E,), jnp.float32),
        ))
    return params


def forward(params, context, context_mask, inputs, inputs_mask, *, num_heads):
    pe = params["pe"]
    # Embedding lookup + positional encoding: XLA glue (gather + add); PE dropout p=0.0.
    ctx_emb = params["embedding"][context] + pe[: context.shape[1]]
    in_emb = params["embedding"][inputs] + pe[: inputs.shape[1]]

    B, S, _ = in_emb.shape
    T = ctx_emb.shape[1]

    # Key-padding masks as tiny float tensors (1.0 = valid key); the causal + padding
    # additive bias is built inside the attention kernels (never hits HBM).
    inputs_kmask = inputs_mask.astype(jnp.float32).reshape(B, 1, S)
    context_kmask = context_mask.astype(jnp.float32).reshape(B, 1, T)

    # bf16 residual stream between kernels; f32 statistics inside kernels.
    x = in_emb.astype(jnp.bfloat16)
    memory = ctx_emb.astype(jnp.bfloat16)

    for p in params["layers"]:
        x = decoder_layer(x, memory, p, inputs_kmask, context_kmask, num_heads)

    # Fused logit projection + log_softmax (f32 output).
    return head_block(x, params["logit_w"], params["logit_b"])


# ---------------------------------- main ----------------------------------- #

if __name__ == "__main__":
    # small shapes consistent with the module's forward
    B = 2
    max_len = 32
    num_tokens = 16
    num_layers = 2
    hidden_dim = 32
    num_heads = 4
    S_ctx = 8
    S_in = 8

    root = jax.random.PRNGKey(0)
    k_param, k_ctx, k_in = jax.random.split(root, 3)

    params = init_params(k_param, max_len, num_tokens, num_layers, hidden_dim)

    context = jax.random.randint(k_ctx, (B, S_ctx), 0, num_tokens, dtype=jnp.int32)
    inputs = jax.random.randint(k_in, (B, S_in), 0, num_tokens, dtype=jnp.int32)
    # padding masks: True = valid token (at least one valid key per query row)
    context_mask = jnp.ones((B, S_ctx), bool).at[:, 6:].set(False)
    inputs_mask = jnp.ones((B, S_in), bool).at[:, 7:].set(False)

    fwd = jax.jit(functools.partial(forward, num_heads=num_heads))
    log_probs = fwd(params, context, context_mask, inputs, inputs_mask)
    log_probs = jax.block_until_ready(log_probs)

    assert log_probs.shape == (B, S_in, num_tokens)
    # sanity: rows are valid log-probabilities
    assert bool(jnp.all(jnp.isfinite(log_probs)))
    assert bool(jnp.allclose(jnp.sum(jnp.exp(log_probs), axis=-1), 1.0, atol=1e-3))

    print("KERNEL_OK")
</pallas_src>

<mosaic_0001>
module attributes {stable_mosaic.version = 11 : i64} {
  func.func @_cross_attn_kernel(%arg0: i32, %arg1: memref<1x8x32xbf16, #tpu.memory_space<vmem>>, %arg2: memref<1x8x32xbf16, #tpu.memory_space<vmem>>, %arg3: memref<1x1x8xf32, #tpu.memory_space<vmem>>, %arg4: memref<1x32xf32, #tpu.memory_space<vmem>>, %arg5: memref<1x32xf32, #tpu.memory_space<vmem>>, %arg6: memref<32x32xbf16, #tpu.memory_space<vmem>>, %arg7: memref<1x32xf32, #tpu.memory_space<vmem>>, %arg8: memref<32x64xbf16, #tpu.memory_space<vmem>>, %arg9: memref<1x64xf32, #tpu.memory_space<vmem>>, %arg10: memref<32x32xbf16, #tpu.memory_space<vmem>>, %arg11: memref<1x32xf32, #tpu.memory_space<vmem>>, %arg12: memref<1x8x32xbf16, #tpu.memory_space<vmem>>) attributes {dimension_semantics = [#tpu.dimension_semantics<parallel>], iteration_bounds = array<i64: 2>, scalar_prefetch = 0 : i64, scratch_operands = 0 : i64, tpu.core_type = #tpu.core_type<tc>, window_params = [{transform_indices = @transform_0, window_bounds = array<i64: 1, 8, 32>}, {transform_indices = @transform_1, window_bounds = array<i64: 1, 8, 32>}, {transform_indices = @transform_2, window_bounds = array<i64: 1, 1, 8>}, {pipeline_mode = #tpu.pipeline_mode<synchronous>, transform_indices = @transform_3, window_bounds = array<i64: 1, 32>}, {pipeline_mode = #tpu.pipeline_mode<synchronous>, transform_indices = @transform_4, window_bounds = array<i64: 1, 32>}, {pipeline_mode = #tpu.pipeline_mode<synchronous>, transform_indices = @transform_5, window_bounds = array<i64: 32, 32>}, {pipeline_mode = #tpu.pipeline_mode<synchronous>, transform_indices = @transform_6, window_bounds = array<i64: 1, 32>}, {pipeline_mode = #tpu.pipeline_mode<synchronous>, transform_indices = @transform_7, window_bounds = array<i64: 32, 64>}, {pipeline_mode = #tpu.pipeline_mode<synchronous>, transform_indices = @transform_8, window_bounds = array<i64: 1, 64>}, {pipeline_mode = #tpu.pipeline_mode<synchronous>, transform_indices = @transform_9, window_bounds = array<i64: 32, 32>}, {pipeline_mode = #tpu.pipeline_mode<synchronous>, transform_indices = @transform_10, window_bounds = array<i64: 1, 32>}, {transform_indices = @transform_11, window_bounds = array<i64: 1, 8, 32>}]} {
    %c0 = arith.constant 0 : index
    %c0_0 = arith.constant 0 : index
    %c0_1 = arith.constant 0 : index
    %0 = vector.load %arg1[%c0, %c0_0, %c0_1] : memref<1x8x32xbf16, #tpu.memory_space<vmem>>, vector<1x8x32xbf16>
    %1 = vector.shape_cast %0 : vector<1x8x32xbf16> to vector<8x32xbf16>
    %2 = arith.extf %1 : vector<8x32xbf16> to vector<8x32xf32>
    %c0_2 = arith.constant 0 : index
    %c0_3 = arith.constant 0 : index
    %c0_4 = arith.constant 0 : index
    %3 = vector.load %arg2[%c0_2, %c0_3, %c0_4] : memref<1x8x32xbf16, #tpu.memory_space<vmem>>, vector<1x8x32xbf16>
    %4 = vector.shape_cast %3 : vector<1x8x32xbf16> to vector<8x32xbf16>
    %5 = arith.extf %4 : vector<8x32xbf16> to vector<8x32xf32>
    %c0_5 = arith.constant 0 : index
    %c0_6 = arith.constant 0 : index
    %6 = vector.load %arg4[%c0_5, %c0_6] : memref<1x32xf32, #tpu.memory_space<vmem>>, vector<1x32xf32>
    %c0_7 = arith.constant 0 : index
    %c0_8 = arith.constant 0 : index
    %7 = vector.load %arg5[%c0_7, %c0_8] : memref<1x32xf32, #tpu.memory_space<vmem>>, vector<1x32xf32>
    %cst = arith.constant dense<0.000000e+00> : vector<8xf32>
    %8 = vector.multi_reduction <add>, %2, %cst [1] : vector<8x32xf32> to vector<8xf32>
    %9 = vector.shape_cast %8 : vector<8xf32> to vector<8x1xf32>
    %cst_9 = arith.constant 3.200000e+01 : f32
    %10 = vector.broadcast %cst_9 : f32 to vector<8x1xf32>
    %11 = arith.divf %9, %10 : vector<8x1xf32>
    %12 = vector.broadcast %11 : vector<8x1xf32> to vector<8x32xf32>
    %13 = arith.subf %2, %12 : vector<8x32xf32>
    %14 = arith.mulf %13, %13 : vector<8x32xf32>
    %cst_10 = arith.constant dense<0.000000e+00> : vector<8xf32>
    %15 = vector.multi_reduction <add>, %14, %cst_10 [1] : vector<8x32xf32> to vector<8xf32>
    %16 = vector.shape_cast %15 : vector<8xf32> to vector<8x1xf32>
    %cst_11 = arith.constant 3.200000e+01 : f32
    %17 = vector.broadcast %cst_11 : f32 to vector<8x1xf32>
    %18 = arith.divf %16, %17 : vector<8x1xf32>
    %cst_12 = arith.constant 9.99999974E-6 : f32
    %19 = vector.broadcast %cst_12 : f32 to vector<8x1xf32>
    %20 = arith.addf %18, %19 : vector<8x1xf32>
    %21 = math.rsqrt %20 : vector<8x1xf32>
    %22 = vector.broadcast %21 : vector<8x1xf32> to vector<8x32xf32>
    %23 = arith.mulf %13, %22 : vector<8x32xf32>
    %24 = vector.broadcast %6 : vector<1x32xf32> to vector<8x32xf32>
    %25 = arith.mulf %23, %24 : vector<8x32xf32>
    %26 = vector.broadcast %7 : vector<1x32xf32> to vector<8x32xf32>
    %27 = arith.addf %25, %26 : vector<8x32xf32>
    %28 = arith.truncf %27 : vector<8x32xf32> to vector<8x32xbf16>
    %c0_13 = arith.constant 0 : index
    %c0_14 = arith.constant 0 : index
    %29 = vector.load %arg6[%c0_13, %c0_14] : memref<32x32xbf16, #tpu.memory_space<vmem>>, vector<32x32xbf16>
    %cst_15 = arith.constant dense<0.000000e+00> : vector<8x32xf32>
    %30 = tpu.matmul %28, %29, %cst_15 {dimension_numbers = #tpu.dot_dimension_numbers<[1], [0], [0], [1], [0, 0, 1, 1], [], []>} : vector<8x32xbf16>, vector<32x32xbf16>, vector<8x32xf32> -> vector<8x32xf32>
    %c0_16 = arith.constant 0 : index
    %c0_17 = arith.constant 0 : index
    %31 = vector.load %arg7[%c0_16, %c0_17] : memref<1x32xf32, #tpu.memory_space<vmem>>, vector<1x32xf32>
    %32 = vector.broadcast %31 : vector<1x32xf32> to vector<8x32xf32>
    %33 = arith.addf %30, %32 : vector<8x32xf32>
    %34 = arith.truncf %5 : vector<8x32xf32> to vector<8x32xbf16>
    %c0_18 = arith.constant 0 : index
    %c0_19 = arith.constant 0 : index
    %35 = vector.load %arg8[%c0_18, %c0_19] : memref<32x64xbf16, #tpu.memory_space<vmem>>, vector<32x64xbf16>
    %cst_20 = arith.constant dense<0.000000e+00> : vector<8x64xf32>
    %36 = tpu.matmul %34, %35, %cst_20 {dimension_numbers = #tpu.dot_dimension_numbers<[1], [0], [0], [1], [0, 0, 1, 1], [], []>} : vector<8x32xbf16>, vector<32x64xbf16>, vector<8x64xf32> -> vector<8x64xf32>
    %c0_21 = arith.constant 0 : index
    %c0_22 = arith.constant 0 : index
    %37 = vector.load %arg9[%c0_21, %c0_22] : memref<1x64xf32, #tpu.memory_space<vmem>>, vector<1x64xf32>
    %38 = vector.broadcast %37 : vector<1x64xf32> to vector<8x64xf32>
    %39 = arith.addf %36, %38 : vector<8x64xf32>
    %40 = vector.extract_strided_slice %39 {offsets = [0, 0], sizes = [8, 32], strides = [1, 1]} : vector<8x64xf32> to vector<8x32xf32>
    %41 = vector.extract_strided_slice %39 {offsets = [0, 32], sizes = [8, 32], strides = [1, 1]} : vector<8x64xf32> to vector<8x32xf32>
    %c0_23 = arith.constant 0 : index
    %c0_24 = arith.constant 0 : index
    %c0_25 = arith.constant 0 : index
    %42 = vector.load %arg3[%c0_23, %c0_24, %c0_25] : memref<1x1x8xf32, #tpu.memory_space<vmem>>, vector<1x1x8xf32>
    %43 = vector.shape_cast %42 : vector<1x1x8xf32> to vector<1x8xf32>
    %cst_26 = arith.constant 5.000000e-01 : f32
    %44 = vector.broadcast %cst_26 : f32 to vector<1x8xf32>
    %45 = arith.cmpf ogt, %43, %44 : vector<1x8xf32>
    %cst_27 = arith.constant 0.000000e+00 : f32
    %cst_28 = arith.constant -1.000000e+30 : f32
    %46 = vector.broadcast %cst_27 : f32 to vector<1x8xf32>
    %47 = vector.broadcast %cst_28 : f32 to vector<1x8xf32>
    %48 = arith.select %45, %46, %47 : vector<1x8xi1>, vector<1x8xf32>
    %49 = vector.shape_cast %48 : vector<1x8xf32> to vector<1x8xf32>
    %50 = vector.broadcast %49 : vector<1x8xf32> to vector<8x8xf32>
    %51 = vector.extract_strided_slice %33 {offsets = [0, 0], sizes = [8, 8], strides = [1, 1]} : vector<8x32xf32> to vector<8x8xf32>
    %52 = vector.extract_strided_slice %33 {offsets = [0, 8], sizes = [8, 8], strides = [1, 1]} : vector<8x32xf32> to vector<8x8xf32>
    %53 = vector.extract_strided_slice %33 {offsets = [0, 16], sizes = [8, 8], strides = [1, 1]} : vector<8x32xf32> to vector<8x8xf32>
    %54 = vector.extract_strided_slice %33 {offsets = [0, 24], sizes = [8, 8], strides = [1, 1]} : vector<8x32xf32> to vector<8x8xf32>
    %55 = vector.shape_cast %51 : vector<8x8xf32> to vector<1x8x8xf32>
    %56 = vector.shape_cast %52 : vector<8x8xf32> to vector<1x8x8xf32>
    %57 = vector.shape_cast %53 : vector<8x8xf32> to vector<1x8x8xf32>
    %58 = vector.shape_cast %54 : vector<8x8xf32> to vector<1x8x8xf32>
    %59 = tpu.concatenate %55, %56, %57, %58 in 0 : vector<1x8x8xf32>, vector<1x8x8xf32>, vector<1x8x8xf32>, vector<1x8x8xf32> -> vector<4x8x8xf32>
    %60 = arith.truncf %59 : vector<4x8x8xf32> to vector<4x8x8xbf16>
    %61 = vector.extract_strided_slice %40 {offsets = [0, 0], sizes = [8, 8], strides = [1, 1]} : vector<8x32xf32> to vector<8x8xf32>
    %62 = vector.extract_strided_slice %40 {offsets = [0, 8], sizes = [8, 8], strides = [1, 1]} : vector<8x32xf32> to vector<8x8xf32>
    %63 = vector.extract_strided_slice %40 {offsets = [0, 16], sizes = [8, 8], strides = [1, 1]} : vector<8x32xf32> to vector<8x8xf32>
    %64 = vector.extract_strided_slice %40 {offsets = [0, 24], sizes = [8, 8], strides = [1, 1]} : vector<8x32xf32> to vector<8x8xf32>
    %65 = vector.shape_cast %61 : vector<8x8xf32> to vector<1x8x8xf32>
    %66 = vector.shape_cast %62 : vector<8x8xf32> to vector<1x8x8xf32>
    %67 = vector.shape_cast %63 : vector<8x8xf32> to vector<1x8x8xf32>
    %68 = vector.shape_cast %64 : vector<8x8xf32> to vector<1x8x8xf32>
    %69 = tpu.concatenate %65, %66, %67, %68 in 0 : vector<1x8x8xf32>, vector<1x8x8xf32>, vector<1x8x8xf32>, vector<1x8x8xf32> -> vector<4x8x8xf32>
    %70 = arith.truncf %69 : vector<4x8x8xf32> to vector<4x8x8xbf16>
    %71 = vector.extract_strided_slice %41 {offsets = [0, 0], sizes = [8, 8], strides = [1, 1]} : vector<8x32xf32> to vector<8x8xf32>
    %72 = vector.extract_strided_slice %41 {offsets = [0, 8], sizes = [8, 8], strides = [1, 1]} : vector<8x32xf32> to vector<8x8xf32>
    %73 = vector.extract_strided_slice %41 {offsets = [0, 16], sizes = [8, 8], strides = [1, 1]} : vector<8x32xf32> to vector<8x8xf32>
    %74 = vector.extract_strided_slice %41 {offsets = [0, 24], sizes = [8, 8], strides = [1, 1]} : vector<8x32xf32> to vector<8x8xf32>
    %75 = vector.shape_cast %71 : vector<8x8xf32> to vector<1x8x8xf32>
    %76 = vector.shape_cast %72 : vector<8x8xf32> to vector<1x8x8xf32>
    %77 = vector.shape_cast %73 : vector<8x8xf32> to vector<1x8x8xf32>
    %78 = vector.shape_cast %74 : vector<8x8xf32> to vector<1x8x8xf32>
    %79 = tpu.concatenate %75, %76, %77, %78 in 0 : vector<1x8x8xf32>, vector<1x8x8xf32>, vector<1x8x8xf32>, vector<1x8x8xf32> -> vector<4x8x8xf32>
    %80 = arith.truncf %79 : vector<4x8x8xf32> to vector<4x8x8xbf16>
    %cst_29 = arith.constant dense<0.000000e+00> : vector<4x8x8xf32>
    %81 = tpu.matmul %60, %70, %cst_29 {dimension_numbers = #tpu.dot_dimension_numbers<[2], [2], [1], [1], [0, 0, 0, 1, 1, 1], [0], [0]>} : vector<4x8x8xbf16>, vector<4x8x8xbf16>, vector<4x8x8xf32> -> vector<4x8x8xf32>
    %cst_30 = arith.constant 0.353553385 : f32
    %82 = vector.broadcast %cst_30 : f32 to vector<4x8x8xf32>
    %83 = arith.mulf %81, %82 : vector<4x8x8xf32>
    %84 = vector.shape_cast %50 : vector<8x8xf32> to vector<1x8x8xf32>
    %85 = vector.broadcast %84 : vector<1x8x8xf32> to vector<4x8x8xf32>
    %86 = arith.addf %83, %85 : vector<4x8x8xf32>
    %cst_31 = arith.constant dense<0xFF800000> : vector<4x8xf32>
    %87 = vector.multi_reduction <maximumf>, %86, %cst_31 [2] : vector<4x8x8xf32> to vector<4x8xf32>
    %88 = vector.shape_cast %87 : vector<4x8xf32> to vector<4x8x1xf32>
    %89 = vector.broadcast %88 : vector<4x8x1xf32> to vector<4x8x8xf32>
    %90 = arith.subf %86, %89 : vector<4x8x8xf32>
    %91 = math.exp %90 : vector<4x8x8xf32>
    %cst_32 = arith.constant dense<0.000000e+00> : vector<4x8xf32>
    %92 = vector.multi_reduction <add>, %91, %cst_32 [2] : vector<4x8x8xf32> to vector<4x8xf32>
    %93 = vector.shape_cast %92 : vector<4x8xf32> to vector<4x8x1xf32>
    %94 = tpu.reciprocal %93 {approx = true} : vector<4x8x1xf32> -> vector<4x8x1xf32>
    %95 = vector.broadcast %94 : vector<4x8x1xf32> to vector<4x8x8xf32>
    %96 = arith.mulf %91, %95 : vector<4x8x8xf32>
    %97 = arith.truncf %96 : vector<4x8x8xf32> to vector<4x8x8xbf16>
    %cst_33 = arith.constant dense<0.000000e+00> : vector<4x8x8xf32>
    %98 = tpu.matmul %97, %80, %cst_33 {dimension_numbers = #tpu.dot_dimension_numbers<[2], [1], [1], [2], [0, 0, 0, 1, 1, 2], [0], [0]>} : vector<4x8x8xbf16>, vector<4x8x8xbf16>, vector<4x8x8xf32> -> vector<4x8x8xf32>
    %99 = vector.extract_strided_slice %98 {offsets = [0, 0, 0], sizes = [1, 8, 8], strides = [1, 1, 1]} : vector<4x8x8xf32> to vector<1x8x8xf32>
    %100 = vector.shape_cast %99 : vector<1x8x8xf32> to vector<8x8xf32>
    %101 = vector.extract_strided_slice %98 {offsets = [1, 0, 0], sizes = [1, 8, 8], strides = [1, 1, 1]} : vector<4x8x8xf32> to vector<1x8x8xf32>
    %102 = vector.shape_cast %101 : vector<1x8x8xf32> to vector<8x8xf32>
    %103 = vector.extract_strided_slice %98 {offsets = [2, 0, 0], sizes = [1, 8, 8], strides = [1, 1, 1]} : vector<4x8x8xf32> to vector<1x8x8xf32>
    %104 = vector.shape_cast %103 : vector<1x8x8xf32> to vector<8x8xf32>
    %105 = vector.extract_strided_slice %98 {offsets = [3, 0, 0], sizes = [1, 8, 8], strides = [1, 1, 1]} : vector<4x8x8xf32> to vector<1x8x8xf32>
    %106 = vector.shape_cast %105 : vector<1x8x8xf32> to vector<8x8xf32>
    %107 = tpu.concatenate %100, %102, %104, %106 in 1 : vector<8x8xf32>, vector<8x8xf32>, vector<8x8xf32>, vector<8x8xf32> -> vector<8x32xf32>
    %108 = arith.truncf %107 : vector<8x32xf32> to vector<8x32xbf16>
    %c0_34 = arith.constant 0 : index
    %c0_35 = arith.constant 0 : index
    %109 = vector.load %arg10[%c0_34, %c0_35] : memref<32x32xbf16, #tpu.memory_space<vmem>>, vector<32x32xbf16>
    %cst_36 = arith.constant dense<0.000000e+00> : vector<8x32xf32>
    %110 = tpu.matmul %108, %109, %cst_36 {dimension_numbers = #tpu.dot_dimension_numbers<[1], [0], [0], [1], [0, 0, 1, 1], [], []>} : vector<8x32xbf16>, vector<32x32xbf16>, vector<8x32xf32> -> vector<8x32xf32>
    %111 = arith.addf %2, %110 : vector<8x32xf32>
    %c0_37 = arith.constant 0 : index
    %c0_38 = arith.constant 0 : index
    %112 = vector.load %arg11[%c0_37, %c0_38] : memref<1x32xf32, #tpu.memory_space<vmem>>, vector<1x32xf32>
    %113 = vector.broadcast %112 : vector<1x32xf32> to vector<8x32xf32>
    %114 = arith.addf %111, %113 : vector<8x32xf32>
    %115 = arith.truncf %114 : vector<8x32xf32> to vector<8x32xbf16>
    %c0_39 = arith.constant 0 : index
    %c0_40 = arith.constant 0 : index
    %c0_41 = arith.constant 0 : index
    %116 = vector.load %arg12[%c0_39, %c0_40, %c0_41] : memref<1x8x32xbf16, #tpu.memory_space<vmem>>, vector<1x8x32xbf16>
    %117 = vector.shape_cast %116 : vector<1x8x32xbf16> to vector<8x32xbf16>
    %118 = vector.shape_cast %115 : vector<8x32xbf16> to vector<1x8x32xbf16>
    tpu.vector_store %arg12[%c0_39, %c0_40, %c0_41], %118 {strides = array<i32>} : memref<1x8x32xbf16, #tpu.memory_space<vmem>>, vector<1x8x32xbf16>,
    return
  }
  func.func @transform_0(%arg0: i32) -> (i32, i32, i32) {
    %c0_i32 = arith.constant 0 : i32
    %c0_i32_0 = arith.constant 0 : i32
    %c0_i32_1 = arith.constant 0 : i32
    return %arg0, %c0_i32, %c0_i32_0 : i32, i32, i32
  }
  func.func @transform_1(%arg0: i32) -> (i32, i32, i32) {
    %c0_i32 = arith.constant 0 : i32
    %c0_i32_0 = arith.constant 0 : i32
    %c0_i32_1 = arith.constant 0 : i32
    return %arg0, %c0_i32, %c0_i32_0 : i32, i32, i32
  }
  func.func @transform_2(%arg0: i32) -> (i32, i32, i32) {
    %c0_i32 = arith.constant 0 : i32
    %c0_i32_0 = arith.constant 0 : i32
    %c0_i32_1 = arith.constant 0 : i32
    return %arg0, %c0_i32, %c0_i32_0 : i32, i32, i32
  }
  func.func @transform_3(%arg0: i32) -> (i32, i32) {
    %c0_i32 = arith.constant 0 : i32
    %c0_i32_0 = arith.constant 0 : i32
    %c0_i32_1 = arith.constant 0 : i32
    return %c0_i32, %c0_i32_0 : i32, i32
  }
  func.func @transform_4(%arg0: i32) -> (i32, i32) {
    %c0_i32 = arith.constant 0 : i32
    %c0_i32_0 = arith.constant 0 : i32
    %c0_i32_1 = arith.constant 0 : i32
    return %c0_i32, %c0_i32_0 : i32, i32
  }
  func.func @transform_5(%arg0: i32) -> (i32, i32) {
    %c0_i32 = arith.constant 0 : i32
    %c0_i32_0 = arith.constant 0 : i32
    %c0_i32_1 = arith.constant 0 : i32
    return %c0_i32, %c0_i32_0 : i32, i32
  }
  func.func @transform_6(%arg0: i32) -> (i32, i32) {
    %c0_i32 = arith.constant 0 : i32
    %c0_i32_0 = arith.constant 0 : i32
    %c0_i32_1 = arith.constant 0 : i32
    return %c0_i32, %c0_i32_0 : i32, i32
  }
  func.func @transform_7(%arg0: i32) -> (i32, i32) {
    %c0_i32 = arith.constant 0 : i32
    %c0_i32_0 = arith.constant 0 : i32
    %c0_i32_1 = arith.constant 0 : i32
    return %c0_i32, %c0_i32_0 : i32, i32
  }
  func.func @transform_8(%arg0: i32) -> (i32, i32) {
    %c0_i32 = arith.constant 0 : i32
    %c0_i32_0 = arith.constant 0 : i32
    %c0_i32_1 = arith.constant 0 : i32
    return %c0_i32, %c0_i32_0 : i32, i32
  }
  func.func @transform_9(%arg0: i32) -> (i32, i32) {
    %c0_i32 = arith.constant 0 : i32
    %c0_i32_0 = arith.constant 0 : i32
    %c0_i32_1 = arith.constant 0 : i32
    return %c0_i32, %c0_i32_0 : i32, i32
  }
  func.func @transform_10(%arg0: i32) -> (i32, i32) {
    %c0_i32 = arith.constant 0 : i32
    %c0_i32_0 = arith.constant 0 : i32
    %c0_i32_1 = arith.constant 0 : i32
    return %c0_i32, %c0_i32_0 : i32, i32
  }
  func.func @transform_11(%arg0: i32) -> (i32, i32, i32) {
    %c0_i32 = arith.constant 0 : i32
    %c0_i32_0 = arith.constant 0 : i32
    %c0_i32_1 = arith.constant 0 : i32
    return %arg0, %c0_i32, %c0_i32_0 : i32, i32, i32
  }
}

module attributes {stable_mosaic.version = 11 : i64} {
  func.func @_self_attn_kernel(%arg0: i32, %arg1: memref<1x8x32xbf16, #tpu.memory_space<vmem>>, %arg2: memref<1x1x8xf32, #tpu.memory_space<vmem>>, %arg3: memref<1x32xf32, #tpu.memory_space<vmem>>, %arg4: memref<1x32xf32, #tpu.memory_space<vmem>>, %arg5: memref<32x96xbf16, #tpu.memory_space<vmem>>, %arg6: memref<1x96xf32, #tpu.memory_space<vmem>>, %arg7: memref<32x32xbf16, #tpu.memory_space<vmem>>, %arg8: memref<1x32xf32, #tpu.memory_space<vmem>>, %arg9: memref<1x8x32xbf16, #tpu.memory_space<vmem>>) attributes {dimension_semantics = [#tpu.dimension_semantics<parallel>], iteration_bounds = array<i64: 2>, scalar_prefetch = 0 : i64, scratch_operands = 0 : i64, tpu.core_type = #tpu.core_type<tc>, window_params = [{transform_indices = @transform_0, window_bounds = array<i64: 1, 8, 32>}, {transform_indices = @transform_1, window_bounds = array<i64: 1, 1, 8>}, {pipeline_mode = #tpu.pipeline_mode<synchronous>, transform_indices = @transform_2, window_bounds = array<i64: 1, 32>}, {pipeline_mode = #tpu.pipeline_mode<synchronous>, transform_indices = @transform_3, window_bounds = array<i64: 1, 32>}, {pipeline_mode = #tpu.pipeline_mode<synchronous>, transform_indices = @transform_4, window_bounds = array<i64: 32, 96>}, {pipeline_mode = #tpu.pipeline_mode<synchronous>, transform_indices = @transform_5, window_bounds = array<i64: 1, 96>}, {pipeline_mode = #tpu.pipeline_mode<synchronous>, transform_indices = @transform_6, window_bounds = array<i64: 32, 32>}, {pipeline_mode = #tpu.pipeline_mode<synchronous>, transform_indices = @transform_7, window_bounds = array<i64: 1, 32>}, {transform_indices = @transform_8, window_bounds = array<i64: 1, 8, 32>}]} {
    %c0 = arith.constant 0 : index
    %c0_0 = arith.constant 0 : index
    %c0_1 = arith.constant 0 : index
    %0 = vector.load %arg1[%c0, %c0_0, %c0_1] : memref<1x8x32xbf16, #tpu.memory_space<vmem>>, vector<1x8x32xbf16>
    %1 = vector.shape_cast %0 : vector<1x8x32xbf16> to vector<8x32xbf16>
    %2 = arith.extf %1 : vector<8x32xbf16> to vector<8x32xf32>
    %c0_2 = arith.constant 0 : index
    %c0_3 = arith.constant 0 : index
    %3 = vector.load %arg3[%c0_2, %c0_3] : memref<1x32xf32, #tpu.memory_space<vmem>>, vector<1x32xf32>
    %c0_4 = arith.constant 0 : index
    %c0_5 = arith.constant 0 : index
    %4 = vector.load %arg4[%c0_4, %c0_5] : memref<1x32xf32, #tpu.memory_space<vmem>>, vector<1x32xf32>
    %cst = arith.constant dense<0.000000e+00> : vector<8xf32>
    %5 = vector.multi_reduction <add>, %2, %cst [1] : vector<8x32xf32> to vector<8xf32>
    %6 = vector.shape_cast %5 : vector<8xf32> to vector<8x1xf32>
    %cst_6 = arith.constant 3.200000e+01 : f32
    %7 = vector.broadcast %cst_6 : f32 to vector<8x1xf32>
    %8 = arith.divf %6, %7 : vector<8x1xf32>
    %9 = vector.broadcast %8 : vector<8x1xf32> to vector<8x32xf32>
    %10 = arith.subf %2, %9 : vector<8x32xf32>
    %11 = arith.mulf %10, %10 : vector<8x32xf32>
    %cst_7 = arith.constant dense<0.000000e+00> : vector<8xf32>
    %12 = vector.multi_reduction <add>, %11, %cst_7 [1] : vector<8x32xf32> to vector<8xf32>
    %13 = vector.shape_cast %12 : vector<8xf32> to vector<8x1xf32>
    %cst_8 = arith.constant 3.200000e+01 : f32
    %14 = vector.broadcast %cst_8 : f32 to vector<8x1xf32>
    %15 = arith.divf %13, %14 : vector<8x1xf32>
    %cst_9 = arith.constant 9.99999974E-6 : f32
    %16 = vector.broadcast %cst_9 : f32 to vector<8x1xf32>
    %17 = arith.addf %15, %16 : vector<8x1xf32>
    %18 = math.rsqrt %17 : vector<8x1xf32>
    %19 = vector.broadcast %18 : vector<8x1xf32> to vector<8x32xf32>
    %20 = arith.mulf %10, %19 : vector<8x32xf32>
    %21 = vector.broadcast %3 : vector<1x32xf32> to vector<8x32xf32>
    %22 = arith.mulf %20, %21 : vector<8x32xf32>
    %23 = vector.broadcast %4 : vector<1x32xf32> to vector<8x32xf32>
    %24 = arith.addf %22, %23 : vector<8x32xf32>
    %25 = arith.truncf %24 : vector<8x32xf32> to vector<8x32xbf16>
    %c0_10 = arith.constant 0 : index
    %c0_11 = arith.constant 0 : index
    %26 = vector.load %arg5[%c0_10, %c0_11] : memref<32x96xbf16, #tpu.memory_space<vmem>>, vector<32x96xbf16>
    %cst_12 = arith.constant dense<0.000000e+00> : vector<8x96xf32>
    %27 = tpu.matmul %25, %26, %cst_12 {dimension_numbers = #tpu.dot_dimension_numbers<[1], [0], [0], [1], [0, 0, 1, 1], [], []>} : vector<8x32xbf16>, vector<32x96xbf16>, vector<8x96xf32> -> vector<8x96xf32>
    %c0_13 = arith.constant 0 : index
    %c0_14 = arith.constant 0 : index
    %28 = vector.load %arg6[%c0_13, %c0_14] : memref<1x96xf32, #tpu.memory_space<vmem>>, vector<1x96xf32>
    %29 = vector.broadcast %28 : vector<1x96xf32> to vector<8x96xf32>
    %30 = arith.addf %27, %29 : vector<8x96xf32>
    %31 = vector.extract_strided_slice %30 {offsets = [0, 0], sizes = [8, 32], strides = [1, 1]} : vector<8x96xf32> to vector<8x32xf32>
    %32 = vector.extract_strided_slice %30 {offsets = [0, 32], sizes = [8, 32], strides = [1, 1]} : vector<8x96xf32> to vector<8x32xf32>
    %33 = vector.extract_strided_slice %30 {offsets = [0, 64], sizes = [8, 32], strides = [1, 1]} : vector<8x96xf32> to vector<8x32xf32>
    %c0_15 = arith.constant 0 : index
    %c0_16 = arith.constant 0 : index
    %c0_17 = arith.constant 0 : index
    %34 = vector.load %arg2[%c0_15, %c0_16, %c0_17] : memref<1x1x8xf32, #tpu.memory_space<vmem>>, vector<1x1x8xf32>
    %35 = vector.shape_cast %34 : vector<1x1x8xf32> to vector<1x8xf32>
    %cst_18 = arith.constant 5.000000e-01 : f32
    %36 = vector.broadcast %cst_18 : f32 to vector<1x8xf32>
    %37 = arith.cmpf ogt, %35, %36 : vector<1x8xf32>
    %cst_19 = arith.constant 0.000000e+00 : f32
    %cst_20 = arith.constant -1.000000e+30 : f32
    %38 = vector.broadcast %cst_19 : f32 to vector<1x8xf32>
    %39 = vector.broadcast %cst_20 : f32 to vector<1x8xf32>
    %40 = arith.select %37, %38, %39 : vector<1x8xi1>, vector<1x8xf32>
    %41 = vector.shape_cast %40 : vector<1x8xf32> to vector<1x8xf32>
    %42 = vector.broadcast %41 : vector<1x8xf32> to vector<8x8xf32>
    %43 = tpu.iota {dimensions = array<i32: 0>} : vector<8x8xi32>
    %44 = tpu.iota {dimensions = array<i32: 1>} : vector<8x8xi32>
    %45 = arith.cmpi sgt, %44, %43 : vector<8x8xi32>
    %cst_21 = arith.constant -1.000000e+30 : f32
    %cst_22 = arith.constant 0.000000e+00 : f32
    %46 = vector.broadcast %cst_21 : f32 to vector<8x8xf32>
    %47 = vector.broadcast %cst_22 : f32 to vector<8x8xf32>
    %48 = arith.select %45, %46, %47 : vector<8x8xi1>, vector<8x8xf32>
    %49 = arith.addf %42, %48 : vector<8x8xf32>
    %50 = vector.extract_strided_slice %31 {offsets = [0, 0], sizes = [8, 8], strides = [1, 1]} : vector<8x32xf32> to vector<8x8xf32>
    %51 = vector.extract_strided_slice %31 {offsets = [0, 8], sizes = [8, 8], strides = [1, 1]} : vector<8x32xf32> to vector<8x8xf32>
    %52 = vector.extract_strided_slice %31 {offsets = [0, 16], sizes = [8, 8], strides = [1, 1]} : vector<8x32xf32> to vector<8x8xf32>
    %53 = vector.extract_strided_slice %31 {offsets = [0, 24], sizes = [8, 8], strides = [1, 1]} : vector<8x32xf32> to vector<8x8xf32>
    %54 = vector.shape_cast %50 : vector<8x8xf32> to vector<1x8x8xf32>
    %55 = vector.shape_cast %51 : vector<8x8xf32> to vector<1x8x8xf32>
    %56 = vector.shape_cast %52 : vector<8x8xf32> to vector<1x8x8xf32>
    %57 = vector.shape_cast %53 : vector<8x8xf32> to vector<1x8x8xf32>
    %58 = tpu.concatenate %54, %55, %56, %57 in 0 : vector<1x8x8xf32>, vector<1x8x8xf32>, vector<1x8x8xf32>, vector<1x8x8xf32> -> vector<4x8x8xf32>
    %59 = arith.truncf %58 : vector<4x8x8xf32> to vector<4x8x8xbf16>
    %60 = vector.extract_strided_slice %32 {offsets = [0, 0], sizes = [8, 8], strides = [1, 1]} : vector<8x32xf32> to vector<8x8xf32>
    %61 = vector.extract_strided_slice %32 {offsets = [0, 8], sizes = [8, 8], strides = [1, 1]} : vector<8x32xf32> to vector<8x8xf32>
    %62 = vector.extract_strided_slice %32 {offsets = [0, 16], sizes = [8, 8], strides = [1, 1]} : vector<8x32xf32> to vector<8x8xf32>
    %63 = vector.extract_strided_slice %32 {offsets = [0, 24], sizes = [8, 8], strides = [1, 1]} : vector<8x32xf32> to vector<8x8xf32>
    %64 = vector.shape_cast %60 : vector<8x8xf32> to vector<1x8x8xf32>
    %65 = vector.shape_cast %61 : vector<8x8xf32> to vector<1x8x8xf32>
    %66 = vector.shape_cast %62 : vector<8x8xf32> to vector<1x8x8xf32>
    %67 = vector.shape_cast %63 : vector<8x8xf32> to vector<1x8x8xf32>
    %68 = tpu.concatenate %64, %65, %66, %67 in 0 : vector<1x8x8xf32>, vector<1x8x8xf32>, vector<1x8x8xf32>, vector<1x8x8xf32> -> vector<4x8x8xf32>
    %69 = arith.truncf %68 : vector<4x8x8xf32> to vector<4x8x8xbf16>
    %70 = vector.extract_strided_slice %33 {offsets = [0, 0], sizes = [8, 8], strides = [1, 1]} : vector<8x32xf32> to vector<8x8xf32>
    %71 = vector.extract_strided_slice %33 {offsets = [0, 8], sizes = [8, 8], strides = [1, 1]} : vector<8x32xf32> to vector<8x8xf32>
    %72 = vector.extract_strided_slice %33 {offsets = [0, 16], sizes = [8, 8], strides = [1, 1]} : vector<8x32xf32> to vector<8x8xf32>
    %73 = vector.extract_strided_slice %33 {offsets = [0, 24], sizes = [8, 8], strides = [1, 1]} : vector<8x32xf32> to vector<8x8xf32>
    %74 = vector.shape_cast %70 : vector<8x8xf32> to vector<1x8x8xf32>
    %75 = vector.shape_cast %71 : vector<8x8xf32> to vector<1x8x8xf32>
    %76 = vector.shape_cast %72 : vector<8x8xf32> to vector<1x8x8xf32>
    %77 = vector.shape_cast %73 : vector<8x8xf32> to vector<1x8x8xf32>
    %78 = tpu.concatenate %74, %75, %76, %77 in 0 : vector<1x8x8xf32>, vector<1x8x8xf32>, vector<1x8x8xf32>, vector<1x8x8xf32> -> vector<4x8x8xf32>
    %79 = arith.truncf %78 : vector<4x8x8xf32> to vector<4x8x8xbf16>
    %cst_23 = arith.constant dense<0.000000e+00> : vector<4x8x8xf32>
    %80 = tpu.matmul %59, %69, %cst_23 {dimension_numbers = #tpu.dot_dimension_numbers<[2], [2], [1], [1], [0, 0, 0, 1, 1, 1], [0], [0]>} : vector<4x8x8xbf16>, vector<4x8x8xbf16>, vector<4x8x8xf32> -> vector<4x8x8xf32>
    %cst_24 = arith.constant 0.353553385 : f32
    %81 = vector.broadcast %cst_24 : f32 to vector<4x8x8xf32>
    %82 = arith.mulf %80, %81 : vector<4x8x8xf32>
    %83 = vector.shape_cast %49 : vector<8x8xf32> to vector<1x8x8xf32>
    %84 = vector.broadcast %83 : vector<1x8x8xf32> to vector<4x8x8xf32>
    %85 = arith.addf %82, %84 : vector<4x8x8xf32>
    %cst_25 = arith.constant dense<0xFF800000> : vector<4x8xf32>
    %86 = vector.multi_reduction <maximumf>, %85, %cst_25 [2] : vector<4x8x8xf32> to vector<4x8xf32>
    %87 = vector.shape_cast %86 : vector<4x8xf32> to vector<4x8x1xf32>
    %88 = vector.broadcast %87 : vector<4x8x1xf32> to vector<4x8x8xf32>
    %89 = arith.subf %85, %88 : vector<4x8x8xf32>
    %90 = math.exp %89 : vector<4x8x8xf32>
    %cst_26 = arith.constant dense<0.000000e+00> : vector<4x8xf32>
    %91 = vector.multi_reduction <add>, %90, %cst_26 [2] : vector<4x8x8xf32> to vector<4x8xf32>
    %92 = vector.shape_cast %91 : vector<4x8xf32> to vector<4x8x1xf32>
    %93 = tpu.reciprocal %92 {approx = true} : vector<4x8x1xf32> -> vector<4x8x1xf32>
    %94 = vector.broadcast %93 : vector<4x8x1xf32> to vector<4x8x8xf32>
    %95 = arith.mulf %90, %94 : vector<4x8x8xf32>
    %96 = arith.truncf %95 : vector<4x8x8xf32> to vector<4x8x8xbf16>
    %cst_27 = arith.constant dense<0.000000e+00> : vector<4x8x8xf32>
    %97 = tpu.matmul %96, %79, %cst_27 {dimension_numbers = #tpu.dot_dimension_numbers<[2], [1], [1], [2], [0, 0, 0, 1, 1, 2], [0], [0]>} : vector<4x8x8xbf16>, vector<4x8x8xbf16>, vector<4x8x8xf32> -> vector<4x8x8xf32>
    %98 = vector.extract_strided_slice %97 {offsets = [0, 0, 0], sizes = [1, 8, 8], strides = [1, 1, 1]} : vector<4x8x8xf32> to vector<1x8x8xf32>
    %99 = vector.shape_cast %98 : vector<1x8x8xf32> to vector<8x8xf32>
    %100 = vector.extract_strided_slice %97 {offsets = [1, 0, 0], sizes = [1, 8, 8], strides = [1, 1, 1]} : vector<4x8x8xf32> to vector<1x8x8xf32>
    %101 = vector.shape_cast %100 : vector<1x8x8xf32> to vector<8x8xf32>
    %102 = vector.extract_strided_slice %97 {offsets = [2, 0, 0], sizes = [1, 8, 8], strides = [1, 1, 1]} : vector<4x8x8xf32> to vector<1x8x8xf32>
    %103 = vector.shape_cast %102 : vector<1x8x8xf32> to vector<8x8xf32>
    %104 = vector.extract_strided_slice %97 {offsets = [3, 0, 0], sizes = [1, 8, 8], strides = [1, 1, 1]} : vector<4x8x8xf32> to vector<1x8x8xf32>
    %105 = vector.shape_cast %104 : vector<1x8x8xf32> to vector<8x8xf32>
    %106 = tpu.concatenate %99, %101, %103, %105 in 1 : vector<8x8xf32>, vector<8x8xf32>, vector<8x8xf32>, vector<8x8xf32> -> vector<8x32xf32>
    %107 = arith.truncf %106 : vector<8x32xf32> to vector<8x32xbf16>
    %c0_28 = arith.constant 0 : index
    %c0_29 = arith.constant 0 : index
    %108 = vector.load %arg7[%c0_28, %c0_29] : memref<32x32xbf16, #tpu.memory_space<vmem>>, vector<32x32xbf16>
    %cst_30 = arith.constant dense<0.000000e+00> : vector<8x32xf32>
    %109 = tpu.matmul %107, %108, %cst_30 {dimension_numbers = #tpu.dot_dimension_numbers<[1], [0], [0], [1], [0, 0, 1, 1], [], []>} : vector<8x32xbf16>, vector<32x32xbf16>, vector<8x32xf32> -> vector<8x32xf32>
    %110 = arith.addf %2, %109 : vector<8x32xf32>
    %c0_31 = arith.constant 0 : index
    %c0_32 = arith.constant 0 : index
    %111 = vector.load %arg8[%c0_31, %c0_32] : memref<1x32xf32, #tpu.memory_space<vmem>>, vector<1x32xf32>
    %112 = vector.broadcast %111 : vector<1x32xf32> to vector<8x32xf32>
    %113 = arith.addf %110, %112 : vector<8x32xf32>
    %114 = arith.truncf %113 : vector<8x32xf32> to vector<8x32xbf16>
    %c0_33 = arith.constant 0 : index
    %c0_34 = arith.constant 0 : index
    %c0_35 = arith.constant 0 : index
    %115 = vector.load %arg9[%c0_33, %c0_34, %c0_35] : memref<1x8x32xbf16, #tpu.memory_space<vmem>>, vector<1x8x32xbf16>
    %116 = vector.shape_cast %115 : vector<1x8x32xbf16> to vector<8x32xbf16>
    %117 = vector.shape_cast %114 : vector<8x32xbf16> to vector<1x8x32xbf16>
    tpu.vector_store %arg9[%c0_33, %c0_34, %c0_35], %117 {strides = array<i32>} : memref<1x8x32xbf16, #tpu.memory_space<vmem>>, vector<1x8x32xbf16>,
    return
  }
  func.func @transform_0(%arg0: i32) -> (i32, i32, i32) {
    %c0_i32 = arith.constant 0 : i32
    %c0_i32_0 = arith.constant 0 : i32
    %c0_i32_1 = arith.constant 0 : i32
    return %arg0, %c0_i32, %c0_i32_0 : i32, i32, i32
  }
  func.func @transform_1(%arg0: i32) -> (i32, i32, i32) {
    %c0_i32 = arith.constant 0 : i32
    %c0_i32_0 = arith.constant 0 : i32
    %c0_i32_1 = arith.constant 0 : i32
    return %arg0, %c0_i32, %c0_i32_0 : i32, i32, i32
  }
  func.func @transform_2(%arg0: i32) -> (i32, i32) {
    %c0_i32 = arith.constant 0 : i32
    %c0_i32_0 = arith.constant 0 : i32
    %c0_i32_1 = arith.constant 0 : i32
    return %c0_i32, %c0_i32_0 : i32, i32
  }
  func.func @transform_3(%arg0: i32) -> (i32, i32) {
    %c0_i32 = arith.constant 0 : i32
    %c0_i32_0 = arith.constant 0 : i32
    %c0_i32_1 = arith.constant 0 : i32
    return %c0_i32, %c0_i32_0 : i32, i32
  }
  func.func @transform_4(%arg0: i32) -> (i32, i32) {
    %c0_i32 = arith.constant 0 : i32
    %c0_i32_0 = arith.constant 0 : i32
    %c0_i32_1 = arith.constant 0 : i32
    return %c0_i32, %c0_i32_0 : i32, i32
  }
  func.func @transform_5(%arg0: i32) -> (i32, i32) {
    %c0_i32 = arith.constant 0 : i32
    %c0_i32_0 = arith.constant 0 : i32
    %c0_i32_1 = arith.constant 0 : i32
    return %c0_i32, %c0_i32_0 : i32, i32
  }
  func.func @transform_6(%arg0: i32) -> (i32, i32) {
    %c0_i32 = arith.constant 0 : i32
    %c0_i32_0 = arith.constant 0 : i32
    %c0_i32_1 = arith.constant 0 : i32
    return %c0_i32, %c0_i32_0 : i32, i32
  }
  func.func @transform_7(%arg0: i32) -> (i32, i32) {
    %c0_i32 = arith.constant 0 : i32
    %c0_i32_0 = arith.constant 0 : i32
    %c0_i32_1 = arith.constant 0 : i32
    return %c0_i32, %c0_i32_0 : i32, i32
  }
  func.func @transform_8(%arg0: i32) -> (i32, i32, i32) {
    %c0_i32 = arith.constant 0 : i32
    %c0_i32_0 = arith.constant 0 : i32
    %c0_i32_1 = arith.constant 0 : i32
    return %arg0, %c0_i32, %c0_i32_0 : i32, i32, i32
  }
}

module attributes {stable_mosaic.version = 11 : i64} {
  func.func @_ffn_kernel(%arg0: i32, %arg1: memref<16x32xbf16, #tpu.memory_space<vmem>>, %arg2: memref<1x32xf32, #tpu.memory_space<vmem>>, %arg3: memref<1x32xf32, #tpu.memory_space<vmem>>, %arg4: memref<32x128xbf16, #tpu.memory_space<vmem>>, %arg5: memref<1x128xf32, #tpu.memory_space<vmem>>, %arg6: memref<128x32xbf16, #tpu.memory_space<vmem>>, %arg7: memref<1x32xf32, #tpu.memory_space<vmem>>, %arg8: memref<16x32xbf16, #tpu.memory_space<vmem>>) attributes {dimension_semantics = [#tpu.dimension_semantics<parallel>], iteration_bounds = array<i64: 1>, scalar_prefetch = 0 : i64, scratch_operands = 0 : i64, tpu.core_type = #tpu.core_type<tc>, window_params = [{transform_indices = @transform_0, window_bounds = array<i64: 16, 32>}, {pipeline_mode = #tpu.pipeline_mode<synchronous>, transform_indices = @transform_1, window_bounds = array<i64: 1, 32>}, {pipeline_mode = #tpu.pipeline_mode<synchronous>, transform_indices = @transform_2, window_bounds = array<i64: 1, 32>}, {pipeline_mode = #tpu.pipeline_mode<synchronous>, transform_indices = @transform_3, window_bounds = array<i64: 32, 128>}, {pipeline_mode = #tpu.pipeline_mode<synchronous>, transform_indices = @transform_4, window_bounds = array<i64: 1, 128>}, {pipeline_mode = #tpu.pipeline_mode<synchronous>, transform_indices = @transform_5, window_bounds = array<i64: 128, 32>}, {pipeline_mode = #tpu.pipeline_mode<synchronous>, transform_indices = @transform_6, window_bounds = array<i64: 1, 32>}, {transform_indices = @transform_7, window_bounds = array<i64: 16, 32>}]} {
    %c0 = arith.constant 0 : index
    %c0_0 = arith.constant 0 : index
    %0 = vector.load %arg1[%c0, %c0_0] : memref<16x32xbf16, #tpu.memory_space<vmem>>, vector<16x32xbf16>
    %1 = arith.extf %0 : vector<16x32xbf16> to vector<16x32xf32>
    %c0_1 = arith.constant 0 : index
    %c0_2 = arith.constant 0 : index
    %2 = vector.load %arg2[%c0_1, %c0_2] : memref<1x32xf32, #tpu.memory_space<vmem>>, vector<1x32xf32>
    %c0_3 = arith.constant 0 : index
    %c0_4 = arith.constant 0 : index
    %3 = vector.load %arg3[%c0_3, %c0_4] : memref<1x32xf32, #tpu.memory_space<vmem>>, vector<1x32xf32>
    %cst = arith.constant dense<0.000000e+00> : vector<16xf32>
    %4 = vector.multi_reduction <add>, %1, %cst [1] : vector<16x32xf32> to vector<16xf32>
    %5 = vector.shape_cast %4 : vector<16xf32> to vector<16x1xf32>
    %cst_5 = arith.constant 3.200000e+01 : f32
    %6 = vector.broadcast %cst_5 : f32 to vector<16x1xf32>
    %7 = arith.divf %5, %6 : vector<16x1xf32>
    %8 = vector.broadcast %7 : vector<16x1xf32> to vector<16x32xf32>
    %9 = arith.subf %1, %8 : vector<16x32xf32>
    %10 = arith.mulf %9, %9 : vector<16x32xf32>
    %cst_6 = arith.constant dense<0.000000e+00> : vector<16xf32>
    %11 = vector.multi_reduction <add>, %10, %cst_6 [1] : vector<16x32xf32> to vector<16xf32>
    %12 = vector.shape_cast %11 : vector<16xf32> to vector<16x1xf32>
    %cst_7 = arith.constant 3.200000e+01 : f32
    %13 = vector.broadcast %cst_7 : f32 to vector<16x1xf32>
    %14 = arith.divf %12, %13 : vector<16x1xf32>
    %cst_8 = arith.constant 9.99999974E-6 : f32
    %15 = vector.broadcast %cst_8 : f32 to vector<16x1xf32>
    %16 = arith.addf %14, %15 : vector<16x1xf32>
    %17 = math.rsqrt %16 : vector<16x1xf32>
    %18 = vector.broadcast %17 : vector<16x1xf32> to vector<16x32xf32>
    %19 = arith.mulf %9, %18 : vector<16x32xf32>
    %20 = vector.broadcast %2 : vector<1x32xf32> to vector<16x32xf32>
    %21 = arith.mulf %19, %20 : vector<16x32xf32>
    %22 = vector.broadcast %3 : vector<1x32xf32> to vector<16x32xf32>
    %23 = arith.addf %21, %22 : vector<16x32xf32>
    %24 = arith.truncf %23 : vector<16x32xf32> to vector<16x32xbf16>
    %c0_9 = arith.constant 0 : index
    %c0_10 = arith.constant 0 : index
    %25 = vector.load %arg4[%c0_9, %c0_10] : memref<32x128xbf16, #tpu.memory_space<vmem>>, vector<32x128xbf16>
    %cst_11 = arith.constant dense<0.000000e+00> : vector<16x128xf32>
    %26 = tpu.matmul %24, %25, %cst_11 {dimension_numbers = #tpu.dot_dimension_numbers<[1], [0], [0], [1], [0, 0, 1, 1], [], []>} : vector<16x32xbf16>, vector<32x128xbf16>, vector<16x128xf32> -> vector<16x128xf32>
    %c0_12 = arith.constant 0 : index
    %c0_13 = arith.constant 0 : index
    %27 = vector.load %arg5[%c0_12, %c0_13] : memref<1x128xf32, #tpu.memory_space<vmem>>, vector<1x128xf32>
    %28 = vector.broadcast %27 : vector<1x128xf32> to vector<16x128xf32>
    %29 = arith.addf %26, %28 : vector<16x128xf32>
    %cst_14 = arith.constant 0.000000e+00 : f32
    %30 = vector.broadcast %cst_14 : f32 to vector<16x128xf32>
    %31 = arith.maximumf %29, %30 : vector<16x128xf32>
    %32 = arith.truncf %31 : vector<16x128xf32> to vector<16x128xbf16>
    %c0_15 = arith.constant 0 : index
    %c0_16 = arith.constant 0 : index
    %33 = vector.load %arg6[%c0_15, %c0_16] : memref<128x32xbf16, #tpu.memory_space<vmem>>, vector<128x32xbf16>
    %cst_17 = arith.constant dense<0.000000e+00> : vector<16x32xf32>
    %34 = tpu.matmul %32, %33, %cst_17 {dimension_numbers = #tpu.dot_dimension_numbers<[1], [0], [0], [1], [0, 0, 1, 1], [], []>} : vector<16x128xbf16>, vector<128x32xbf16>, vector<16x32xf32> -> vector<16x32xf32>
    %c0_18 = arith.constant 0 : index
    %c0_19 = arith.constant 0 : index
    %35 = vector.load %arg7[%c0_18, %c0_19] : memref<1x32xf32, #tpu.memory_space<vmem>>, vector<1x32xf32>
    %36 = vector.broadcast %35 : vector<1x32xf32> to vector<16x32xf32>
    %37 = arith.addf %34, %36 : vector<16x32xf32>
    %38 = arith.addf %1, %37 : vector<16x32xf32>
    %39 = arith.truncf %38 : vector<16x32xf32> to vector<16x32xbf16>
    %c0_20 = arith.constant 0 : index
    %c0_21 = arith.constant 0 : index
    %40 = vector.load %arg8[%c0_20, %c0_21] : memref<16x32xbf16, #tpu.memory_space<vmem>>, vector<16x32xbf16>
    tpu.vector_store %arg8[%c0_20, %c0_21], %39 {strides = array<i32>} : memref<16x32xbf16, #tpu.memory_space<vmem>>, vector<16x32xbf16>,
    return
  }
  func.func @transform_0(%arg0: i32) -> (i32, i32) {
    %c0_i32 = arith.constant 0 : i32
    %c0_i32_0 = arith.constant 0 : i32
    return %arg0, %c0_i32 : i32, i32
  }
  func.func @transform_1(%arg0: i32) -> (i32, i32) {
    %c0_i32 = arith.constant 0 : i32
    %c0_i32_0 = arith.constant 0 : i32
    %c0_i32_1 = arith.constant 0 : i32
    return %c0_i32, %c0_i32_0 : i32, i32
  }
  func.func @transform_2(%arg0: i32) -> (i32, i32) {
    %c0_i32 = arith.constant 0 : i32
    %c0_i32_0 = arith.constant 0 : i32
    %c0_i32_1 = arith.constant 0 : i32
    return %c0_i32, %c0_i32_0 : i32, i32
  }
  func.func @transform_3(%arg0: i32) -> (i32, i32) {
    %c0_i32 = arith.constant 0 : i32
    %c0_i32_0 = arith.constant 0 : i32
    %c0_i32_1 = arith.constant 0 : i32
    return %c0_i32, %c0_i32_0 : i32, i32
  }
  func.func @transform_4(%arg0: i32) -> (i32, i32) {
    %c0_i32 = arith.constant 0 : i32
    %c0_i32_0 = arith.constant 0 : i32
    %c0_i32_1 = arith.constant 0 : i32
    return %c0_i32, %c0_i32_0 : i32, i32
  }
  func.func @transform_5(%arg0: i32) -> (i32, i32) {
    %c0_i32 = arith.constant 0 : i32
    %c0_i32_0 = arith.constant 0 : i32
    %c0_i32_1 = arith.constant 0 : i32
    return %c0_i32, %c0_i32_0 : i32, i32
  }
  func.func @transform_6(%arg0: i32) -> (i32, i32) {
    %c0_i32 = arith.constant 0 : i32
    %c0_i32_0 = arith.constant 0 : i32
    %c0_i32_1 = arith.constant 0 : i32
    return %c0_i32, %c0_i32_0 : i32, i32
  }
  func.func @transform_7(%arg0: i32) -> (i32, i32) {
    %c0_i32 = arith.constant 0 : i32
    %c0_i32_0 = arith.constant 0 : i32
    return %arg0, %c0_i32 : i32, i32
  }
}

module attributes {stable_mosaic.version = 11 : i64} {
  func.func @_head_kernel(%arg0: i32, %arg1: memref<16x32xbf16, #tpu.memory_space<vmem>>, %arg2: memref<32x16xbf16, #tpu.memory_space<vmem>>, %arg3: memref<1x16xf32, #tpu.memory_space<vmem>>, %arg4: memref<16x16xf32, #tpu.memory_space<vmem>>) attributes {dimension_semantics = [#tpu.dimension_semantics<parallel>], iteration_bounds = array<i64: 1>, scalar_prefetch = 0 : i64, scratch_operands = 0 : i64, tpu.core_type = #tpu.core_type<tc>, window_params = [{transform_indices = @transform_0, window_bounds = array<i64: 16, 32>}, {pipeline_mode = #tpu.pipeline_mode<synchronous>, transform_indices = @transform_1, window_bounds = array<i64: 32, 16>}, {pipeline_mode = #tpu.pipeline_mode<synchronous>, transform_indices = @transform_2, window_bounds = array<i64: 1, 16>}, {transform_indices = @transform_3, window_bounds = array<i64: 16, 16>}]} {
    %c0 = arith.constant 0 : index
    %c0_0 = arith.constant 0 : index
    %0 = vector.load %arg1[%c0, %c0_0] : memref<16x32xbf16, #tpu.memory_space<vmem>>, vector<16x32xbf16>
    %c0_1 = arith.constant 0 : index
    %c0_2 = arith.constant 0 : index
    %1 = vector.load %arg2[%c0_1, %c0_2] : memref<32x16xbf16, #tpu.memory_space<vmem>>, vector<32x16xbf16>
    %cst = arith.constant dense<0.000000e+00> : vector<16x16xf32>
    %2 = tpu.matmul %0, %1, %cst {dimension_numbers = #tpu.dot_dimension_numbers<[1], [0], [0], [1], [0, 0, 1, 1], [], []>} : vector<16x32xbf16>, vector<32x16xbf16>, vector<16x16xf32> -> vector<16x16xf32>
    %c0_3 = arith.constant 0 : index
    %c0_4 = arith.constant 0 : index
    %3 = vector.load %arg3[%c0_3, %c0_4] : memref<1x16xf32, #tpu.memory_space<vmem>>, vector<1x16xf32>
    %4 = vector.broadcast %3 : vector<1x16xf32> to vector<16x16xf32>
    %5 = arith.addf %2, %4 : vector<16x16xf32>
    %cst_5 = arith.constant dense<0xFF800000> : vector<16xf32>
    %6 = vector.multi_reduction <maximumf>, %5, %cst_5 [1] : vector<16x16xf32> to vector<16xf32>
    %7 = vector.shape_cast %6 : vector<16xf32> to vector<16x1xf32>
    %8 = vector.broadcast %7 : vector<16x1xf32> to vector<16x16xf32>
    %9 = arith.subf %5, %8 : vector<16x16xf32>
    %10 = math.exp %9 : vector<16x16xf32>
    %cst_6 = arith.constant dense<0.000000e+00> : vector<16xf32>
    %11 = vector.multi_reduction <add>, %10, %cst_6 [1] : vector<16x16xf32> to vector<16xf32>
    %12 = vector.shape_cast %11 : vector<16xf32> to vector<16x1xf32>
    %13 = math.log %12 : vector<16x1xf32>
    %14 = vector.broadcast %13 : vector<16x1xf32> to vector<16x16xf32>
    %15 = arith.subf %9, %14 : vector<16x16xf32>
    %c0_7 = arith.constant 0 : index
    %c0_8 = arith.constant 0 : index
    %16 = vector.load %arg4[%c0_7, %c0_8] : memref<16x16xf32, #tpu.memory_space<vmem>>, vector<16x16xf32>
    tpu.vector_store %arg4[%c0_7, %c0_8], %15 {strides = array<i32>} : memref<16x16xf32, #tpu.memory_space<vmem>>, vector<16x16xf32>,
    return
  }
  func.func @transform_0(%arg0: i32) -> (i32, i32) {
    %c0_i32 = arith.constant 0 : i32
    %c0_i32_0 = arith.constant 0 : i32
    return %arg0, %c0_i32 : i32, i32
  }
  func.func @transform_1(%arg0: i32) -> (i32, i32) {
    %c0_i32 = arith.constant 0 : i32
    %c0_i32_0 = arith.constant 0 : i32
    %c0_i32_1 = arith.constant 0 : i32
    return %c0_i32, %c0_i32_0 : i32, i32
  }
  func.func @transform_2(%arg0: i32) -> (i32, i32) {
    %c0_i32 = arith.constant 0 : i32
    %c0_i32_0 = arith.constant 0 : i32
    %c0_i32_1 = arith.constant 0 : i32
    return %c0_i32, %c0_i32_0 : i32, i32
  }
  func.func @transform_3(%arg0: i32) -> (i32, i32) {
    %c0_i32 = arith.constant 0 : i32
    %c0_i32_0 = arith.constant 0 : i32
    return %arg0, %c0_i32 : i32, i32
  }
}

</mosaic_0001>

<bundles_post_ra>
// kernel: forward.13
= control target key start
LH: loop header
LB: loop body
LE: loop exit
PB: predicated region body
PF: predicated region fallthrough
CT: control target
= control target key end

     0   :  { %v188_v1 = vmov 0.0   ;;  %vm189_vm0 = vmmov 0   ;;  %s234_s0 = inlined_call_operand.vmem [shape: bf16[16,32], index: 0, kind: input, shape index: {}]   ;;  %s235_s1 = inlined_call_operand.vmem [shape: bf16[32,16], index: 1, kind: input, shape index: {}]   ;;  %s236_s2 = inlined_call_operand.vmem [shape: f32[1,16], index: 2, kind: input, shape index: {}]   ;;  %s237_s3 = inlined_call_operand.hbm [shape: f32[16,16], index: 3, kind: output, shape index: {}]  }
   0x1   :  { %v155_v0 = vld [vmem:[%s235_s1 + $0x8] sm:$0xff]   ;;  %142 = vmatprep.subr.bf16.mxu0 %v188_v1  ;;  %v156_v2 = vld [vmem:[%s235_s1] sm:$0xff]   ;;  %146 = vmatprep.mubr.msk.bf16.mxu0 %vm189_vm0, %v188_v1 }
   0x2   :  { %143 = vmatpush3.bf16.msra.mxu0 %v155_v0 }
   0x3   :  { %144 = vmatprep.subr.bf16.mxu0 %v188_v1 }
   0x4   :  { %8 = vsyncpa [#allocation3], 0  ;;  %v157_v3 = vld [vmem:[%s234_s0] sm:$0xff]   ;;  %vm46_vm1 = vcmask 261120   ;;  %vm91_vm2 = vcmask 130048   ;;  %s190_s0 = smov [#allocation2]  }
   0x5   :  { %v134_v4 = vld [vmem:[%s236_s2] ss:$0 sm:$0xff]  ;;  %s123_s1 = sshll.u32 %s190_s0, 4  ;;  %s124_s1 = int_to_ptr.vmem [resolvable:$true] %s123_s1 }
   0x6   :  { %145 = vmatpush3.bf16.msra.mxu0 %v156_v2  ;;  %s166_s2 = scalar_lea.vmem %s124_s1, 256  ;;  %p171_p1 = scmp.lt.s32.totalorder %s124_s1, %s124_s1 }
   0x7   :  { %p167_p0 = scmp.ne.s32.totalorder %s124_s1, %s166_s2  ;;  %p172_p2 = scmp.lt.s32.totalorder %s166_s2, %s166_s2 }
   0x9   :  { %147 = vmatmul.mubr.msk.bf16.vlgmr.msra.gmra.mxu0 %vm46_vm1, %v157_v3  ;;  %p173_p3 = por %p172_p2, %p171_p1 }
   0xb   :  { %p174_p4 = pnand %p173_p3, %p167_p0 }
  0xc9   :  { %v84_v5 = vpop.f32.mrf.mxu0 }
  0xca   :  { %v85_v6 = vadd.f32 %v134_v4, %v84_v5 }
  0xcb   :  { %v148_v7 = vpop.f32.mrf.mxu0 }
  0xcc   :  { %v92_v8 = vsel %vm91_vm2, %v85_v6, -inf }
  0xcd   :  { %93 = vmax.xlane.f32.xlu0 %v92_v8  ;;  %v87_v9 = vpop.f32.mrf.mxu0 }
  0xce   :  { %v88_v10 = vadd.f32 %v134_v4, %v87_v9 }
  0xcf   :  { %v149_v11 = vpop.f32.mrf.mxu0 }
  0xd0   :  { %v95_v12 = vsel %vm91_vm2, %v88_v10, -inf }
  0xd1   :  { %96 = vmax.xlane.f32.xlu0 %v95_v12 }
 0x156   :  { %v94_v13 = vpop.xlane.xlu0 %93 }
 0x157   :  { %v98_v14 = vsub.f32 %v85_v6, %v94_v13 }
 0x159   :  { %v100_v15 = vmul.f32 1.442695, %v98_v14 }
 0x15a   :  { %v97_v16 = vpop.xlane.xlu0 %96 }
 0x15b   :  { %158 = vpow2.f32 %v100_v15  ;;  %v99_v17 = vsub.f32 %v88_v10, %v97_v16 }
 0x15d   :  { %v102_v18 = vmul.f32 1.442695, %v99_v17 }
 0x15f   :  { %160 = vpow2.f32 %v102_v18 }
 0x168   :  { %v159_v19 = vpop.eup %158 }
 0x169   :  { %v104_v20 = vsel %vm91_vm2, %v159_v19, 0.0 }
 0x16a   :  { %105 = vadd.xlane.f32.xlu1 %v104_v20 }
 0x16c   :  { %v161_v21 = vpop.eup %160 }
 0x16d   :  { %v107_v22 = vsel %vm91_vm2, %v161_v21, 0.0 }
 0x16e   :  { %108 = vadd.xlane.f32.xlu1 %v107_v22 }
 0x1f3   :  { %v106_v23 = vpop.xlane.xlu1 %105 }
 0x1f4   :  { %162 = vlog2.f32 %v106_v23 }
 0x1f7   :  { %v109_v24 = vpop.xlane.xlu1 %108 }
 0x1f8   :  { %164 = vlog2.f32 %v109_v24 }
 0x201   :  { %v163_v25 = vpop.eup %162 }
 0x202   :  { %v111_v26 = vmul.f32 0.6931472, %v163_v25 }
 0x204   :  { %v114_v27 = vsub.f32 %v98_v14, %v111_v26 }
 0x205   :  { %v165_v28 = vpop.eup %164 }
 0x206   :  { %116 = vst.msk [vmem:[#allocation2] sm:$0xff] %vm91_vm2, %v114_v27  ;;  %v113_v29 = vmul.f32 0.6931472, %v165_v28 }
 0x208   :  { %v115_v30 = vsub.f32 %v99_v17, %v113_v29 }
 0x20a   :  { %117 = vst.msk [vmem:[#allocation2 + $0x8] sm:$0xff] %vm91_vm2, %v115_v30 }
 0x20b   :  { %177 = shalt.err (!%p174_p4)
}
 0x20c   :  { %s191_s20 = smov 128   ;;  %s192_s21 = smov 8  }
 0x20d   :  { %129 = dma.vmem_to_hbm [thread:$0]  %s124_s1, 256, %s237_s3, [#allocation3], %s191_s20, %s191_s20, %s192_s21  }
 0x20e   :  { %186 = dma.done.wait [#allocation3], 256  }
 0x20f   :  { %187 = vsyncadd [#allocation3], 4294967040 }
 0x210   :  { %133 = vsyncpa [#allocation3], 1 }

// kernel: forward.9
= control target key start
LH: loop header
LB: loop body
LE: loop exit
PB: predicated region body
PF: predicated region fallthrough
CT: control target
= control target key end

     0   :  { %vm33_vm0 = vcmask 261120   ;;  %v356_v15 = vmov 0.0   ;;  %vm357_vm1 = vmmov 0   ;;  %vm270_vm2 = vcmask 257024   ;;  %s464_s0 = inlined_call_operand.vmem [shape: bf16[16,32], index: 0, kind: input, shape index: {}]   ;;  %s465_s3 = inlined_call_operand.vmem [shape: bf16[32,128], index: 3, kind: input, shape index: {}]   ;;  %s466_s5 = inlined_call_operand.vmem [shape: bf16[128,32], index: 5, kind: input, shape index: {}]   ;;  %s467_s1 = inlined_call_operand.vmem [shape: f32[1,32], index: 1, kind: input, shape index: {}]   ;;  %s468_s2 = inlined_call_operand.vmem [shape: f32[1,32], index: 2, kind: input, shape index: {}]   ;;  %s469_s4 = inlined_call_operand.vmem [shape: f32[1,128], index: 4, kind: input, shape index: {}]   ;;  %s470_s6 = inlined_call_operand.vmem [shape: f32[1,32], index: 6, kind: input, shape index: {}]   ;;  %s471_s7 = inlined_call_operand.vmem [shape: bf16[16,32], index: 7, kind: output, shape index: {}]  }
   0x1   :  { %v297_v0 = vld [vmem:[%s464_s0] sm:$0xff]   ;;  %312 = vmatprep.subr.bf16.mxu0 %v356_v15  ;;  %v342_v16 = vld [vmem:[%s465_s3 + $0x8] sm:$0xff]   ;;  %316 = vmatprep.mubr.msk.bf16.mxu0 %vm357_vm1, %v356_v15  ;;  %v344_v18 = vld [vmem:[%s466_s5 + $0x38] sm:$0xff]  }
   0x2   :  { %v401_v1 = vunpack.c.l.bf16 %v297_v0  ;;  %v403_v2 = vunpack.c.h.bf16 %v297_v0  ;;  %320 = vmatprep.subr.bf16.mxu1 %v356_v15  ;;  %336 = vmatprep.mubr.msk.bf16.mxu1 %vm357_vm1, %v356_v15  ;;  %v343_v17 = vld [vmem:[%s465_s3] sm:$0xff]   ;;  %v345_v19 = vld [vmem:[%s466_s5 + $0x30] sm:$0xff]   ;;  %v346_v20 = vld [vmem:[%s466_s5 + $0x28] sm:$0xff]  }
   0x3   :  { %313 = vmatpush3.bf16.msra.mxu0 %v342_v16  ;;  %321 = vmatpush3.bf16.msra.mxu1 %v344_v18  ;;  %v347_v21 = vld [vmem:[%s466_s5 + $0x20] sm:$0xff]   ;;  %v348_v22 = vld [vmem:[%s466_s5 + $0x18] sm:$0xff]   ;;  %v349_v40 = vld [vmem:[%s466_s5 + $0x10] sm:$0xff]  }
   0x4   :  { %v34_v3 = vsel %vm33_vm0, %v401_v1, 0.0  ;;  %v37_v4 = vsel %vm33_vm0, %v403_v2, 0.0  ;;  %314 = vmatprep.subr.bf16.mxu0 %v356_v15  ;;  %322 = vmatprep.subr.bf16.mxu1 %v356_v15  ;;  %v277_v31 = vld [vmem:[%s467_s1] ss:$0 sm:$0xff]  ;;  %v350_v41 = vld [vmem:[%s466_s5 + $0x8] sm:$0xff]  }
   0x5   :  { %35 = vadd.xlane.f32.xlu0 %v34_v3  ;;  %v278_v35 = vld [vmem:[%s468_s2] ss:$0 sm:$0xff] }
   0x6   :  { %v351_v42 = vld [vmem:[%s466_s5] sm:$0xff]  }
   0x7   :  { %315 = vmatpush3.bf16.msra.mxu0 %v343_v17  ;;  %323 = vmatpush3.bf16.msra.mxu1 %v345_v19  ;;  %v279_v43 = vld [vmem:[%s469_s4] ss:$0 sm:$0xff] }
   0x8   :  { %324 = vmatprep.subr.bf16.mxu1 %v356_v15  ;;  %v283_v53 = vld [vmem:[%s470_s6] ss:$0 sm:$0xff] }
   0x9   :  { %38 = vadd.xlane.f32.xlu0 %v37_v4 }
   0xb   :  { %325 = vmatpush3.bf16.msra.mxu1 %v346_v20 }
   0xc   :  { %326 = vmatprep.subr.bf16.mxu1 %v356_v15 }
   0xf   :  { %327 = vmatpush3.bf16.msra.mxu1 %v347_v21 }
  0x10   :  { %328 = vmatprep.subr.bf16.mxu1 %v356_v15 }
  0x13   :  { %329 = vmatpush3.bf16.msra.mxu1 %v348_v22 }
  0x14   :  { %330 = vmatprep.subr.bf16.mxu1 %v356_v15 }
  0x17   :  { %331 = vmatpush3.bf16.msra.mxu1 %v349_v40 }
  0x18   :  { %332 = vmatprep.subr.bf16.mxu1 %v356_v15 }
  0x1b   :  { %333 = vmatpush3.bf16.msra.mxu1 %v350_v41 }
  0x1c   :  { %334 = vmatprep.subr.bf16.mxu1 %v356_v15 }
  0x1f   :  { %335 = vmatpush3.bf16.msra.mxu1 %v351_v42 }
  0x8e   :  { %v36_v5 = vpop.xlane.xlu0 %35 }
  0x8f   :  { %v41_v6 = vmul.f32 0.03125, %v36_v5 }
  0x91   :  { %v43_v7 = vsub.f32 %v401_v1, %v41_v6 }
  0x92   :  { %v39_v8 = vpop.xlane.xlu0 %38 }
  0x93   :  { %v42_v9 = vmul.f32 0.03125, %v39_v8  ;;  %v45_v10 = vmul.f32 %v43_v7, %v43_v7 }
  0x95   :  { %v44_v11 = vsub.f32 %v403_v2, %v42_v9  ;;  %v47_v12 = vsel %vm33_vm0, %v45_v10, 0.0 }
  0x96   :  { %48 = vadd.xlane.f32.xlu1 %v47_v12 }
  0x97   :  { %v46_v13 = vmul.f32 %v44_v11, %v44_v11 }
  0x99   :  { %v50_v14 = vsel %vm33_vm0, %v46_v13, 0.0 }
  0x9a   :  { %51 = vadd.xlane.f32.xlu1 %v50_v14 }
 0x11f   :  { %v49_v23 = vpop.xlane.xlu1 %48 }
 0x120   :  { %v53_v24 = vmul.f32 0.03125, %v49_v23 }
 0x122   :  { %v55_v25 = vadd.f32 1e-05, %v53_v24 }
 0x123   :  { %v52_v26 = vpop.xlane.xlu1 %51 }
 0x124   :  { %352 = vrsqrt.f32 %v55_v25  ;;  %v54_v27 = vmul.f32 0.03125, %v52_v26 }
 0x126   :  { %v56_v28 = vadd.f32 1e-05, %v54_v27 }
 0x128   :  { %354 = vrsqrt.f32 %v56_v28 }
 0x131   :  { %v353_v29 = vpop.eup %352 }
 0x132   :  { %v59_v30 = vmul.f32 %v353_v29, %v43_v7 }
 0x134   :  { %v67_v34 = vmul.f32 %v277_v31, %v59_v30 }
 0x135   :  { %v355_v32 = vpop.eup %354 }
 0x136   :  { %v60_v33 = vmul.f32 %v355_v32, %v44_v11  ;;  %v75_v37 = vadd.f32 %v278_v35, %v67_v34 }
 0x138   :  { %v68_v36 = vmul.f32 %v277_v31, %v60_v33 }
 0x13a   :  { %v76_v38 = vadd.f32 %v278_v35, %v68_v36 }
 0x13c   :  { %v77_v39 = vpack.c.bf16 %v76_v38, %v75_v37 }
 0x13e   :  { %317 = vmatmul.mubr.msk.bf16.vlgmr.msra.gmra.mxu0 %vm33_vm0, %v77_v39 }
 0x1fe   :  { %v138_v44 = vpop.f32.mrf.mxu0 }
 0x1ff   :  { %v139_v46 = vadd.f32 %v279_v43, %v138_v44 }
 0x200   :  { %v318_v45 = vpop.f32.mrf.mxu0 }
 0x201   :  { %v145_v50 = vmax.f32 %v139_v46, 0.0 }
 0x202   :  { %v141_v47 = vpop.f32.mrf.mxu0 }
 0x203   :  { %v142_v48 = vadd.f32 %v279_v43, %v141_v47 }
 0x204   :  { %v319_v49 = vpop.f32.mrf.mxu0 }
 0x205   :  { %v146_v51 = vmax.f32 %v142_v48, 0.0 }
 0x207   :  { %v147_v52 = vpack.c.bf16 %v146_v51, %v145_v50 }
 0x209   :  { %337 = vmatmul.mubr.bf16.vlgmr.msra.gmra.mxu1 %v147_v52 }
 0x2c9   :  { %v253_v54 = vpop.f32.mrf.mxu1 }
 0x2ca   :  { %v254_v55 = vadd.f32 %v283_v53, %v253_v54 }
 0x2cb   :  { %v338_v56 = vpop.f32.mrf.mxu1 }
 0x2cc   :  { %v260_v57 = vadd.f32 %v401_v1, %v254_v55 }
 0x2cd   :  { %v256_v58 = vpop.f32.mrf.mxu1 }
 0x2ce   :  { %v294_v59 = vpack.c.bf16 %v260_v57, %v260_v57  ;;  %v257_v60 = vadd.f32 %v283_v53, %v256_v58 }
 0x2cf   :  { %v339_v61 = vpop.f32.mrf.mxu1 }
 0x2d0   :  { %271 = vst.msk [vmem:[%s471_s7] sm:$0xf] %vm270_vm2, %v294_v59  ;;  %v261_v62 = vadd.f32 %v403_v2, %v257_v60 }
 0x2d2   :  { %v295_v63 = vpack.c.bf16 %v261_v62, %v261_v62 }
 0x2d4   :  { %272 = vst.msk [vmem:[%s471_s7 + $0x4] sm:$0xf] %vm270_vm2, %v295_v63 }

// kernel: forward.7
= control target key start
LH: loop header
LB: loop body
LE: loop exit
PB: predicated region body
PF: predicated region fallthrough
CT: control target
= control target key end

     0   :  { %s1261_s27 = smov 0   ;;  %s1404_s0 = inlined_call_operand.vmem [shape: bf16[2,8,32], index: 0, kind: input, shape index: {}]   ;;  %s1405_s1 = inlined_call_operand.vmem [shape: f32[2,1,8], index: 1, kind: input, shape index: {}]   ;;  %s1406_s2 = inlined_call_operand.vmem [shape: f32[1,32], index: 2, kind: input, shape index: {}]   ;;  %s1407_s3 = inlined_call_operand.vmem [shape: f32[1,32], index: 3, kind: input, shape index: {}]   ;;  %s1408_s4 = inlined_call_operand.vmem [shape: bf16[32,96], index: 4, kind: input, shape index: {}]   ;;  %s1409_s5 = inlined_call_operand.vmem [shape: f32[1,96], index: 5, kind: input, shape index: {}]   ;;  %s1410_s6 = inlined_call_operand.vmem [shape: bf16[32,32], index: 6, kind: input, shape index: {}]   ;;  %s1411_s7 = inlined_call_operand.vmem [shape: f32[1,32], index: 7, kind: input, shape index: {}]   ;;  %s1412_s8 = inlined_call_operand.vmem [shape: bf16[2,8,32], index: 8, kind: output, shape index: {}]  }
   0x1 LB: > { %s1043_s28 = sadd.s32 4294967295, %s1203_s27   ;;  %p1047_p0 = scmp.ge.s32.totalorder %s1203_s27, 1  ;;  %s1203_s27 = sphi %s1261_s27, %s18_s27  }
   0x2   : > { %p269_p1 = scmp.lt.s32.totalorder %s1203_s27, 3 }
   0x4   : > { %p270_p2 = pnand %p1047_p0, %p269_p1 }
   0x5   : > { %p304_p3 = scmp.lt.s32.totalorder (!%p270_p2), %s1043_s28, 1  ;;  %s1207_s21 = smov (!%p270_p2), 104  }
   0x6   : > { %273 = sbr.rel (%p270_p2) target bundleno = 1792 (0x700), region = 52  ;;  %s1208_s22 = smov (!%p270_p2), 120  }
   0x7   : > { %s1209_s23 = smov (!%p270_p2), 112   ;;  %s1210_s24 = smov (!%p270_p2), 96  }
   0x8   : > { %s1212_s9 = smov (!%p270_p2), 64   ;;  %s1213_s14 = smov (!%p270_p2), 8  }
   0x9   : > { %s1214_s15 = smov (!%p270_p2), 16   ;;  %s1215_s16 = smov (!%p270_p2), 24  }
   0xb   : > { %s1414_s28 = smov (!%p304_p3, %s1043_s28), 1  ;;  %vm320_vm0 = vcmask 261120   ;;  %v1175_v8 = vld [vmem:[%s1408_s4 + $0x8] sm:$0xff]   ;;  %v1205_v9 = vmov 0.0   ;;  %vm1206_vm1 = vmmov 0   ;;  %v1176_v10 = vld [vmem:[%s1408_s4] sm:$0xff]   ;;  %v420_v42 = vlaneseq }
   0xc   : > { %s1048_s29 = sshll.u32 %s1414_s28, 2  ;;  %1092 = vmatprep.subr.bf16.mxu0 %v1205_v9  ;;  %1096 = vmatprep.mubr.msk.bf16.mxu0 %vm1206_vm1, %v1205_v9  ;;  %v1050_v15 = vld [vmem:[%s1406_s2] ss:$0 sm:$0xff]  ;;  %vm449_vm2 = vcmask 64512   ;;  %s310_s30 = scalar_lea.vmem %s1405_s1, %s1414_s28  ;;  %v1211_v47 = vmov -1e+30  }
   0xd   : > { %s307_s10 = scalar_lea.vmem %s1404_s0, %s1048_s29  ;;  %1093 = vmatpush3.bf16.msra.mxu0 %v1175_v8  ;;  %1100 = vmatprep.subr.bf16.mxu1 %v1205_v9  ;;  %v1051_v17 = vld [vmem:[%s1407_s3] ss:$0 sm:$0xff]  ;;  %v421_v44 = vshrl.u32 %v420_v42, 7  ;;  %v428_v45 = vand.u32 127, %v420_v42  ;;  %vm704_vm5 = vcmask 1043456   ;;  %vm905_vm6 = vcmask 130048  }
   0xe   : > { %v316_v0 = vld [vmem:[%s307_s10] sm:$0xf]  ;;  %1094 = vmatprep.subr.bf16.mxu0 %v1205_v9  ;;  %1102 = vmatprep.mubr.msk.bf16.mxu1 %vm1206_vm1, %v1205_v9  ;;  %vm907_vm7 = vcmask 195584   ;;  %vm979_vm8 = vcmask 257024  }
   0xf   : > { %v1277_v1 = vunpack.c.l.bf16 %v316_v0  ;;  %v1052_v21 = vld [vmem:[%s1409_s5] ss:$0 sm:$0xff]  ;;  %v422_v46 = vsub.s32 0, %v421_v44  ;;  %vm429_vm4 = vcmp.gt.s32.totalorder %v428_v45, %v421_v44 }
  0x10   : > { %v416_v43 = vld [vmem:[%s310_s30] sm:$0x1]  ;;  %v430_v50 = vsel %vm429_vm4, -1e+30, %v1205_v9 }
  0x11   : > { %v321_v2 = vsel %vm320_vm0, %v1277_v1, 0.0  ;;  %1095 = vmatpush3.bf16.msra.mxu0 %v1176_v10  ;;  %vm417_vm3 = vcmp.gt.f32.partialorder %v416_v43, 0.5 }
  0x12   : > { %322 = vadd.xlane.f32.xlu0 %v321_v2  ;;  %1106 = vmatprep.subr.bf16.mxu0 %v1205_v9  ;;  %v418_v48 = vsel %vm417_vm3, 0.0, %v1211_v47 }
  0x13   : > { %v423_v49 = vrot.slane %v418_v48, %v422_v46 }
  0x15   : > { %v431_v51 = vadd.f32 %v430_v50, %v423_v49 }
  0x9b   : > { %v323_v3 = vpop.xlane.xlu0 %322 }
  0x9c   : > { %v325_v4 = vmul.f32 0.03125, %v323_v3 }
  0x9e   : > { %v326_v5 = vsub.f32 %v1277_v1, %v325_v4 }
  0xa0   : > { %v327_v6 = vmul.f32 %v326_v5, %v326_v5 }
  0xa2   : > { %v328_v7 = vsel %vm320_vm0, %v327_v6, 0.0 }
  0xa3   : > { %329 = vadd.xlane.f32.xlu0 %v328_v7 }
 0x12c   : > { %v330_v11 = vpop.xlane.xlu0 %329 }
 0x12d   : > { %v331_v12 = vmul.f32 0.03125, %v330_v11 }
 0x12f   : > { %v332_v13 = vadd.f32 1e-05, %v331_v12 }
 0x131   : > { %1179 = vrsqrt.f32 %v332_v13 }
 0x13e   : > { %v1180_v14 = vpop.eup %1179 }
 0x13f   : > { %v334_v16 = vmul.f32 %v1180_v14, %v326_v5 }
 0x141   : > { %v341_v18 = vmul.f32 %v1050_v15, %v334_v16 }
 0x143   : > { %v348_v19 = vadd.f32 %v1051_v17, %v341_v18 }
 0x145   : > { %v349_v20 = vpack.c.bf16 %v348_v19, %v348_v19 }
 0x147   : > { %1097 = vmatmul.mubr.msk.bf16.vlgmr.msra.gmra.mxu0 %vm320_vm0, %v349_v20 }
 0x148   : > { %1108 = vmatprep.mubr.msk.bf16.mxu0 %vm1206_vm1, %v1205_v9 }
 0x207   : > { %v410_v22 = vpop.f32.mrf.mxu0 }
 0x208   : > { %v411_v23 = vadd.f32 %v1052_v21, %v410_v22 }
 0x209   : > { %v1098_v24 = vpop.f32.mrf.mxu0 }
 0x20a   : > { %439 = vrot.lane.b32.xlu0 %v411_v23, %s1207_s21  ;;  %433 = vrot.lane.b32.xlu1 %v411_v23, %s1208_s22  ;;  %v1309_v27 = vpack.c.bf16 %v411_v23, %v411_v23  ;;  %s314_s21 = scalar_lea.vmem %s1412_s8, %s1048_s29 }
 0x20b   : > { %v413_v25 = vpop.f32.mrf.mxu0 }
 0x20d   : > { %v1099_v26 = vpop.f32.mrf.mxu0 }
 0x20e   : > { %436 = vrot.lane.b32.xlu1 %v411_v23, %s1209_s23 }
 0x212   : > { %447 = vrot.lane.b32.xlu1 %v1309_v27, %s1210_s24 }
 0x27c   : > { %v434_v28 = vpop.permute.xlu1 %433  ;;  %v440_v32 = vpop.permute.xlu0 %439 }
 0x27d   : > { %v1312_v29 = vpack.c.bf16 %v434_v28, %v434_v28  ;;  %v1318_v34 = vpack.c.bf16 %v440_v32, %v440_v32 }
 0x27f   : > { %497 = vrot.lane.b32.xlu1 %v1312_v29, %s1210_s24 }
 0x280   : > { %v437_v30 = vpop.permute.xlu1 %436 }
 0x281   : > { %v1315_v31 = vpack.c.bf16 %v437_v30, %v437_v30 }
 0x283   : > { %546 = vrot.lane.b32.xlu1 %v1315_v31, %s1210_s24 }
 0x284   : > { %v448_v33 = vpop.permute.xlu1 %447 }
 0x285   : > { %v454_v35 = vsel %vm449_vm2, %v448_v33, 0 }
 0x286   : > { %1101 = vmatpush3.bf16.xpose.msra.mxu1 %v454_v35 }
 0x287   : > { %595 = vrot.lane.b32.xlu1 %v1318_v34, %s1210_s24  ;;  %1112 = vmatprep.subr.bf16.mxu1 %v1205_v9 }
 0x28d   : > { %1103 = vmatmul.mubr.msk.bf16.vlgmr.msra.gmra.mxu1 %vm449_vm2, %v1309_v27 }
 0x28e   : > { %1114 = vmatprep.mubr.msk.bf16.mxu1 %vm1206_vm1, %v1205_v9 }
 0x2f1   : > { %v498_v36 = vpop.permute.xlu1 %497 }
 0x2f2   : > { %v503_v37 = vsel %vm449_vm2, %v498_v36, 0 }
 0x2f3   : > { %1107 = vmatpush3.bf16.xpose.msra.mxu0 %v503_v37 }
 0x2f4   : > { %1118 = vmatprep.subr.bf16.mxu0 %v1205_v9 }
 0x2f5   : > { %v547_v38 = vpop.permute.xlu1 %546 }
 0x2f6   : > { %v552_v39 = vsel %vm449_vm2, %v547_v38, 0 }
 0x2f7   : > { %1113 = vmatpush3.bf16.xpose.msra.mxu1 %v552_v39 }
 0x2f8   : > { %1124 = vmatprep.subr.bf16.mxu1 %v1205_v9 }
 0x2f9   : > { %v596_v40 = vpop.permute.xlu1 %595 }
 0x2fa   : > { %v601_v41 = vsel %vm449_vm2, %v596_v40, 0  ;;  %1109 = vmatmul.mubr.msk.bf16.vlgmr.msra.gmra.mxu0 %vm449_vm2, %v1312_v29 }
 0x2fb   : > { %1119 = vmatpush3.bf16.xpose.msra.mxu0 %v601_v41  ;;  %1120 = vmatprep.mubr.msk.bf16.mxu0 %vm1206_vm1, %v1205_v9 }
 0x2fc   : > { %1130 = vmatprep.subr.bf16.mxu0 %v1205_v9 }
 0x2fe   : > { %1115 = vmatmul.mubr.msk.bf16.vlgmr.msra.gmra.mxu1 %vm449_vm2, %v1315_v31 }
 0x2ff   : > { %1126 = vmatprep.mubr.msk.bf16.mxu1 %vm1206_vm1, %v1205_v9 }
 0x302   : > { %1121 = vmatmul.mubr.msk.bf16.vlgmr.msra.gmra.mxu0 %vm449_vm2, %v1318_v34 }
 0x303   : > { %1132 = vmatprep.mubr.msk.bf16.mxu0 %vm1206_vm1, %v1205_v9 }
 0x34d   : > { %v490_v52 = vpop.f32.mrf.mxu1 }
 0x34e   : > { %v643_v53 = vmul.f32 0.35355338, %v490_v52 }
 0x34f   : > { %v1104_v54 = vpop.f32.mrf.mxu1 }
 0x350   : > { %v647_v55 = vadd.f32 %v643_v53, %v431_v51 }
 0x351   : > { %v493_v56 = vpop.f32.mrf.mxu1 }
 0x352   : > { %v651_v57 = vsel %vm449_vm2, %v647_v55, -inf }
 0x353   : > { %652 = vmax.xlane.f32.xlu1 %v651_v57  ;;  %v1105_v58 = vpop.f32.mrf.mxu1 }
 0x3ba   : > { %v539_v59 = vpop.f32.mrf.mxu0 }
 0x3bb   : > { %v644_v60 = vmul.f32 0.35355338, %v539_v59 }
 0x3bc   : > { %v1110_v61 = vpop.f32.mrf.mxu0 }
 0x3bd   : > { %v648_v62 = vadd.f32 %v644_v60, %v431_v51 }
 0x3be   : > { %v542_v63 = vpop.f32.mrf.mxu0  ;;  %v588_v0 = vpop.f32.mrf.mxu1 }
 0x3bf   : > { %v645_v2 = vmul.f32 0.35355338, %v588_v0  ;;  %v654_v3 = vsel %vm449_vm2, %v648_v62, -inf }
 0x3c0   : > { %v1116_v4 = vpop.f32.mrf.mxu1  ;;  %655 = vmax.xlane.f32.xlu0 %v654_v3  ;;  %v1111_v5 = vpop.f32.mrf.mxu0  ;;  %v1177_v3 = vld [vmem:[%s1410_s6 + $0x8] sm:$0xff]  }
 0x3c1   : > { %v649_v6 = vadd.f32 %v645_v2, %v431_v51  ;;  %v1178_v4 = vld [vmem:[%s1410_s6] sm:$0xff]  }
 0x3c2   : > { %v591_v7 = vpop.f32.mrf.mxu1  ;;  %v637_v8 = vpop.f32.mrf.mxu0 }
 0x3c3   : > { %v646_v10 = vmul.f32 0.35355338, %v637_v8  ;;  %v657_v11 = vsel %vm449_vm2, %v649_v6, -inf }
 0x3c4   : > { %658 = vmax.xlane.f32.xlu1 %v657_v11  ;;  %v1117_v12 = vpop.f32.mrf.mxu1  ;;  %v1122_v13 = vpop.f32.mrf.mxu0 }
 0x3c5   : > { %v650_v14 = vadd.f32 %v646_v10, %v431_v51 }
 0x3c6   : > { %v640_v15 = vpop.f32.mrf.mxu0 }
 0x3c7   : > { %v660_v16 = vsel %vm449_vm2, %v650_v14, -inf }
 0x3c8   : > { %661 = vmax.xlane.f32.xlu0 %v660_v16  ;;  %v1123_v17 = vpop.f32.mrf.mxu0 }
 0x3d5   : > { %699 = vrot.lane.b32.xlu1 %v1309_v27, %s1212_s9 }
 0x3dc   : > { %v653_v18 = vpop.xlane.xlu1 %652 }
 0x3dd   : > { %v663_v19 = vsub.f32 %v647_v55, %v653_v18 }
 0x3df   : > { %v667_v20 = vmul.f32 1.442695, %v663_v19 }
 0x3e1   : > { %1181 = vpow2.f32 %v667_v20 }
 0x3ee   : > { %v1182_v21 = vpop.eup %1181 }
 0x3ef   : > { %v675_v22 = vsel %vm449_vm2, %v1182_v21, 0.0 }
 0x3f9   : > { %676 = vadd.xlane.f32.xlu1 %v675_v22 }
 0x449   : > { %v656_v23 = vpop.xlane.xlu0 %655 }
 0x44a   : > { %v664_v24 = vsub.f32 %v648_v62, %v656_v23 }
 0x44c   : > { %v669_v25 = vmul.f32 1.442695, %v664_v24 }
 0x44d   : > { %v659_v26 = vpop.xlane.xlu1 %658 }
 0x44e   : > { %1183 = vpow2.f32 %v669_v25  ;;  %v665_v28 = vsub.f32 %v649_v6, %v659_v26  ;;  %v1067_v25 = vld [vmem:[%s1411_s7] ss:$0 sm:$0xff] }
 0x450   : > { %v671_v30 = vmul.f32 1.442695, %v665_v28 }
 0x451   : > { %v700_v32 = vpop.permute.xlu1 %699  ;;  %v662_v33 = vpop.xlane.xlu0 %661 }
 0x452   : > { %1185 = vpow2.f32 %v671_v30  ;;  %v706_v27 = vsel %vm704_vm5, %v700_v32, 0  ;;  %v666_v35 = vsub.f32 %v650_v14, %v662_v33 }
 0x453   : > { %1125 = vmatpush3.bf16.msra.mxu1 %v706_v27 }
 0x454   : > { %v673_v36 = vmul.f32 1.442695, %v666_v35  ;;  %1136 = vmatprep.subr.bf16.mxu1 %v1205_v9 }
 0x456   : > { %1187 = vpow2.f32 %v673_v36 }
 0x45b   : > { %v1184_v37 = vpop.eup %1183 }
 0x45c   : > { %v678_v38 = vsel %vm449_vm2, %v1184_v37, 0.0 }
 0x45d   : > { %679 = vadd.xlane.f32.xlu0 %v678_v38 }
 0x45f   : > { %v1186_v39 = vpop.eup %1185 }
 0x460   : > { %v681_v40 = vsel %vm449_vm2, %v1186_v39, 0.0 }
 0x461   : > { %682 = vadd.xlane.f32.xlu1 %v681_v40 }
 0x463   : > { %v1188_v41 = vpop.eup %1187 }
 0x464   : > { %v684_v42 = vsel %vm449_vm2, %v1188_v41, 0.0 }
 0x465   : > { %685 = vadd.xlane.f32.xlu0 %v684_v42 }
 0x472   : > { %796 = vrot.lane.b32.xlu1 %v1315_v31, %s1212_s9 }
 0x476   : > { %844 = vrot.lane.b32.xlu1 %v1318_v34, %s1212_s9 }
 0x47b   : > { %748 = vrot.lane.b32.xlu0 %v1312_v29, %s1212_s9 }
 0x482   : > { %v677_v43 = vpop.xlane.xlu1 %676 }
 0x483   : > { %1189 = vrcp.f32 %v677_v43 }
 0x490   : > { %v1190_v44 = vpop.eup %1189 }
 0x491   : > { %v691_v45 = vmul.f32 %v1190_v44, %v1182_v21 }
 0x493   : > { %v695_v46 = vpack.c.bf16 %v691_v45, %v691_v45 }
 0x495   : > { %1127 = vmatmul.mubr.msk.bf16.vlgmr.msra.gmra.mxu1 %vm449_vm2, %v695_v46 }
 0x496   : > { %1138 = vmatprep.mubr.msk.bf16.mxu1 %vm1206_vm1, %v1205_v9 }
 0x4e6   : > { %v680_v47 = vpop.xlane.xlu0 %679 }
 0x4e7   : > { %1191 = vrcp.f32 %v680_v47 }
 0x4ea   : > { %v683_v48 = vpop.xlane.xlu1 %682 }
 0x4eb   : > { %1193 = vrcp.f32 %v683_v48 }
 0x4ee   : > { %v797_v31 = vpop.permute.xlu1 %796  ;;  %v686_v49 = vpop.xlane.xlu0 %685 }
 0x4ef   : > { %v802_v34 = vsel %vm704_vm5, %v797_v31, 0  ;;  %1195 = vrcp.f32 %v686_v49 }
 0x4f0   : > { %1137 = vmatpush3.bf16.msra.mxu1 %v802_v34 }
 0x4f1   : > { %1148 = vmatprep.subr.bf16.mxu1 %v1205_v9 }
 0x4f2   : > { %v749_v29 = vpop.permute.xlu0 %748  ;;  %v845_v53 = vpop.permute.xlu1 %844 }
 0x4f3   : > { %v754_v50 = vsel %vm704_vm5, %v749_v29, 0  ;;  %v850_v56 = vsel %vm704_vm5, %v845_v53, 0 }
 0x4f4   : > { %v1192_v51 = vpop.eup %1191  ;;  %1131 = vmatpush3.bf16.msra.mxu0 %v754_v50 }
 0x4f5   : > { %1142 = vmatprep.subr.bf16.mxu0 %v1205_v9  ;;  %v692_v52 = vmul.f32 %v1192_v51, %v1184_v37 }
 0x4f7   : > { %v696_v54 = vpack.c.bf16 %v692_v52, %v692_v52 }
 0x4f8   : > { %v1194_v55 = vpop.eup %1193 }
 0x4f9   : > { %1133 = vmatmul.mubr.msk.bf16.vlgmr.msra.gmra.mxu0 %vm449_vm2, %v696_v54  ;;  %v693_v57 = vmul.f32 %v1194_v55, %v1186_v39 }
 0x4fa   : > { %1143 = vmatpush3.bf16.msra.mxu0 %v850_v56  ;;  %1144 = vmatprep.mubr.msk.bf16.mxu0 %vm1206_vm1, %v1205_v9 }
 0x4fb   : > { %v697_v58 = vpack.c.bf16 %v693_v57, %v693_v57 }
 0x4fc   : > { %v1196_v59 = vpop.eup %1195 }
 0x4fd   : > { %1139 = vmatmul.mubr.msk.bf16.vlgmr.msra.gmra.mxu1 %vm449_vm2, %v697_v58  ;;  %v694_v60 = vmul.f32 %v1196_v59, %v1188_v41 }
 0x4fe   : > { %1152 = vmatprep.mubr.msk.bf16.mxu1 %vm1206_vm1, %v1205_v9  ;;  %1149 = vmatpush3.bf16.msra.mxu1 %v1177_v3 }
 0x4ff   : > { %v698_v61 = vpack.c.bf16 %v694_v60, %v694_v60  ;;  %1150 = vmatprep.subr.bf16.mxu1 %v1205_v9 }
 0x501   : > { %1145 = vmatmul.mubr.msk.bf16.vlgmr.msra.gmra.mxu0 %vm449_vm2, %v698_v61 }
 0x502   : > { %1151 = vmatpush3.bf16.msra.mxu1 %v1178_v4 }
 0x555   : > { %v742_v62 = vpop.f32.mrf.mxu1 }
 0x557   : > { %v1128_v63 = vpop.f32.mrf.mxu1 }
 0x559   : > { %v745_v0 = vpop.f32.mrf.mxu1 }
 0x55b   : > { %v1129_v2 = vpop.f32.mrf.mxu1 }
 0x5b9   : > { %v790_v5 = vpop.f32.mrf.mxu0 }
 0x5ba   : > { %893 = vrot.lane.b32.xlu0 %v790_v5, %s1213_s14 }
 0x5bb   : > { %v1134_v6 = vpop.f32.mrf.mxu0 }
 0x5bd   : > { %v793_v7 = vpop.f32.mrf.mxu0  ;;  %v838_v8 = vpop.f32.mrf.mxu1 }
 0x5be   : > { %897 = vrot.lane.b32.xlu1 %v838_v8, %s1214_s15 }
 0x5bf   : > { %v1135_v10 = vpop.f32.mrf.mxu0  ;;  %v1140_v11 = vpop.f32.mrf.mxu1 }
 0x5c1   : > { %v841_v12 = vpop.f32.mrf.mxu1  ;;  %v886_v13 = vpop.f32.mrf.mxu0 }
 0x5c2   : > { %901 = vrot.lane.b32.xlu0 %v886_v13, %s1215_s16 }
 0x5c3   : > { %v1141_v9 = vpop.f32.mrf.mxu1  ;;  %v1146_v14 = vpop.f32.mrf.mxu0 }
 0x5c5   : > { %v889_v15 = vpop.f32.mrf.mxu0 }
 0x5c7   : > { %v1147_v16 = vpop.f32.mrf.mxu0 }
 0x62c   : > { %v894_v17 = vpop.permute.xlu0 %893 }
 0x62d   : > { %v904_v19 = vsel %vm449_vm2, %v742_v62, %v894_v17 }
 0x630   : > { %v898_v18 = vpop.permute.xlu1 %897 }
 0x631   : > { %v906_v20 = vsel %vm905_vm6, %v904_v19, %v898_v18 }
 0x634   : > { %v902_v21 = vpop.permute.xlu0 %901 }
 0x635   : > { %v908_v22 = vsel %vm907_vm7, %v906_v20, %v902_v21 }
 0x636   : > { %v909_v23 = vpack.c.bf16 %v908_v22, %v908_v22 }
 0x638   : > { %1153 = vmatmul.mubr.msk.bf16.vlgmr.msra.gmra.mxu1 %vm320_vm0, %v909_v23 }
 0x6f8   : > { %v963_v24 = vpop.f32.mrf.mxu1 }
 0x6f9   : > { %v969_v26 = vadd.f32 %v963_v24, %v1277_v1 }
 0x6fa   : > { %v1154_v28 = vpop.f32.mrf.mxu1 }
 0x6fb   : > { %v977_v30 = vadd.f32 %v1067_v25, %v969_v26 }
 0x6fc   : > { %v966_v32 = vpop.f32.mrf.mxu1 }
 0x6fd   : > { %v978_v33 = vpack.c.bf16 %v977_v30, %v977_v30 }
 0x6fe   : > { %v1155_v27 = vpop.f32.mrf.mxu1 }
 0x6ff   : > { %980 = vst.msk [vmem:[%s314_s21] sm:$0xf] %vm979_vm8, %v978_v33 }
 0x700 PF: > { %s18_s27 = sadd.s32 1, %s1203_s27  }
 0x701   : > { %p15_p4 = scmp.ge.s32.totalorder %s18_s27, 4  }
 0x703   :  { %17 = sbr.rel (!%p15_p4) target bundleno = 1 (0x1), region = 85 }

// kernel: forward.8
= control target key start
LH: loop header
LB: loop body
LE: loop exit
PB: predicated region body
PF: predicated region fallthrough
CT: control target
= control target key end

     0   :  { %s1468_s17 = smov 0   ;;  %s1624_s0 = inlined_call_operand.vmem [shape: bf16[2,8,32], index: 0, kind: input, shape index: {}]   ;;  %s1625_s1 = inlined_call_operand.vmem [shape: bf16[2,8,32], index: 1, kind: input, shape index: {}]   ;;  %s1626_s2 = inlined_call_operand.vmem [shape: f32[2,1,8], index: 2, kind: input, shape index: {}]   ;;  %s1627_s3 = inlined_call_operand.vmem [shape: f32[1,32], index: 3, kind: input, shape index: {}]   ;;  %s1628_s4 = inlined_call_operand.vmem [shape: f32[1,32], index: 4, kind: input, shape index: {}]   ;;  %s1629_s5 = inlined_call_operand.vmem [shape: bf16[32,32], index: 5, kind: input, shape index: {}]   ;;  %s1630_s6 = inlined_call_operand.vmem [shape: f32[1,32], index: 6, kind: input, shape index: {}]   ;;  %s1631_s7 = inlined_call_operand.vmem [shape: bf16[32,64], index: 7, kind: input, shape index: {}]   ;;  %s1632_s8 = inlined_call_operand.vmem [shape: f32[1,64], index: 8, kind: input, shape index: {}]   ;;  %s1633_s9 = inlined_call_operand.vmem [shape: bf16[32,32], index: 9, kind: input, shape index: {}]   ;;  %s1634_s10 = inlined_call_operand.vmem [shape: f32[1,32], index: 10, kind: input, shape index: {}]   ;;  %s1635_s11 = inlined_call_operand.vmem [shape: bf16[2,8,32], index: 11, kind: output, shape index: {}]  }
   0x1 LB: > { %s1219_s18 = sadd.s32 4294967295, %s1396_s17   ;;  %p1223_p0 = scmp.ge.s32.totalorder %s1396_s17, 1  ;;  %s1396_s17 = sphi %s1468_s17, %s21_s17  }
   0x2   : > { %p353_p1 = scmp.lt.s32.totalorder %s1396_s17, 3 }
   0x4   : > { %p354_p2 = pnand %p1223_p0, %p353_p1 }
   0x5   : > { %p398_p3 = scmp.lt.s32.totalorder (!%p354_p2), %s1219_s18, 1  ;;  %s1400_s24 = smov (!%p354_p2), 120  }
   0x6   : > { %357 = sbr.rel (%p354_p2) target bundleno = 1669 (0x685), region = 64  ;;  %s1401_s25 = smov (!%p354_p2), 112  }
   0x7   : > { %s1402_s26 = smov (!%p354_p2), 104   ;;  %s1405_s20 = smov (!%p354_p2), 8  }
   0x8   : > { %s1406_s21 = smov (!%p354_p2), 16  }
   0xb   : > { %s1637_s18 = smov (!%p398_p3, %s1219_s18), 1  ;;  %vm419_vm0 = vcmask 261120   ;;  %v1366_v8 = vld [vmem:[%s1631_s7 + $0x8] sm:$0xff]   ;;  %v1398_v9 = vmov 0.0   ;;  %v1367_v10 = vld [vmem:[%s1631_s7] sm:$0xff]   ;;  %vm1399_vm1 = vmmov 0   ;;  %v802_v54 = vlaneseq }
   0xc   : > { %s1479_s19 = sshll.u32 %s1637_s18, 2  ;;  %1284 = vmatprep.subr.bf16.mxu1 %v1398_v9  ;;  %1276 = vmatprep.subr.bf16.mxu0 %v1398_v9  ;;  %v1368_v11 = vld [vmem:[%s1629_s5 + $0x8] sm:$0xff]   ;;  %v1369_v12 = vld [vmem:[%s1629_s5] sm:$0xff]   ;;  %vm612_vm2 = vcmask 64512   ;;  %s408_s12 = scalar_lea.vmem %s1626_s2, %s1637_s18  ;;  %v1403_v58 = vmov -1e+30  }
   0xd   : > { %s401_s22 = scalar_lea.vmem %s1624_s0, %s1479_s19  ;;  %1285 = vmatpush3.bf16.msra.mxu1 %v1366_v8  ;;  %s405_s29 = scalar_lea.vmem %s1625_s1, %s1479_s19  ;;  %1288 = vmatprep.mubr.msk.bf16.mxu1 %vm1399_vm1, %v1398_v9  ;;  %v1227_v18 = vld [vmem:[%s1627_s3] ss:$0 sm:$0xff]  ;;  %v803_v56 = vshrl.u32 %v802_v54, 7  ;;  %vm865_vm4 = vcmask 1043456   ;;  %vm1069_vm5 = vcmask 130048   ;;  %vm1071_vm6 = vcmask 195584  }
   0xe   : > { %v414_v0 = vld [vmem:[%s401_s22] sm:$0xf]  ;;  %1286 = vmatprep.subr.bf16.mxu1 %v1398_v9  ;;  %1280 = vmatprep.mubr.msk.bf16.mxu0 %vm1399_vm1, %v1398_v9  ;;  %s1404_s18 = smov 96   ;;  %s1407_s22 = smov 24   ;;  %vm1143_vm7 = vcmask 257024  }
   0xf   : > { %v1485_v1 = vunpack.c.l.bf16 %v414_v0  ;;  %1277 = vmatpush3.bf16.msra.mxu0 %v1368_v11  ;;  %v416_v13 = vld [vmem:[%s405_s29] sm:$0xf]  ;;  %v804_v57 = vsub.s32 0, %v803_v56  ;;  %s412_s27 = scalar_lea.vmem %s1635_s11, %s1479_s19 }
  0x10   : > { %1278 = vmatprep.subr.bf16.mxu0 %v1398_v9  ;;  %v1228_v20 = vld [vmem:[%s1628_s4] ss:$0 sm:$0xff] }
  0x11   : > { %v420_v2 = vsel %vm419_vm0, %v1485_v1, 0.0  ;;  %1287 = vmatpush3.bf16.msra.mxu1 %v1367_v10  ;;  %v1233_v24 = vld [vmem:[%s1632_s8] ss:$0 sm:$0xff] }
  0x12   : > { %421 = vadd.xlane.f32.xlu0 %v420_v2  ;;  %1298 = vmatprep.subr.bf16.mxu1 %v1398_v9  ;;  %v1229_v35 = vld [vmem:[%s1630_s6] ss:$0 sm:$0xff] }
  0x13   : > { %1279 = vmatpush3.bf16.msra.mxu0 %v1369_v12  ;;  %v581_v55 = vld [vmem:[%s408_s12] sm:$0x1] }
  0x14   : > { %1289 = vmatmul.mubr.msk.bf16.vlgmr.msra.gmra.mxu1 %vm419_vm0, %v416_v13  ;;  %1292 = vmatprep.subr.bf16.mxu0 %v1398_v9  ;;  %vm582_vm3 = vcmp.gt.f32.partialorder %v581_v55, 0.5 }
  0x15   : > { %1300 = vmatprep.mubr.msk.bf16.mxu1 %vm1399_vm1, %v1398_v9  ;;  %v583_v59 = vsel %vm582_vm3, 0.0, %v1403_v58 }
  0x16   : > { %v805_v60 = vrot.slane %v583_v59, %v804_v57 }
  0x9b   : > { %v422_v3 = vpop.xlane.xlu0 %421 }
  0x9c   : > { %v424_v4 = vmul.f32 0.03125, %v422_v3 }
  0x9e   : > { %v425_v5 = vsub.f32 %v1485_v1, %v424_v4 }
  0xa0   : > { %v426_v6 = vmul.f32 %v425_v5, %v425_v5 }
  0xa2   : > { %v427_v7 = vsel %vm419_vm0, %v426_v6, 0.0 }
  0xa3   : > { %428 = vadd.xlane.f32.xlu0 %v427_v7 }
  0xd4   : > { %v575_v25 = vpop.f32.mrf.mxu1 }
  0xd5   : > { %v576_v26 = vadd.f32 %v1233_v24, %v575_v25 }
  0xd6   : > { %v1290_v27 = vpop.f32.mrf.mxu1 }
  0xd7   : > { %599 = vrot.lane.b32.xlu1 %v576_v26, %s1400_s24  ;;  %v1532_v28 = vpack.c.bf16 %v576_v26, %v576_v26 }
  0xd8   : > { %v578_v29 = vpop.f32.mrf.mxu1 }
  0xd9   : > { %v617_v30 = vsel %vm612_vm2, %v1532_v28, 0 }
  0xda   : > { %v1291_v31 = vpop.f32.mrf.mxu1 }
  0xdb   : > { %602 = vrot.lane.b32.xlu1 %v576_v26, %s1401_s25 }
  0xdf   : > { %605 = vrot.lane.b32.xlu1 %v576_v26, %s1402_s26 }
 0x12c   : > { %v429_v14 = vpop.xlane.xlu0 %428 }
 0x12d   : > { %v430_v15 = vmul.f32 0.03125, %v429_v14 }
 0x12f   : > { %v431_v16 = vadd.f32 1e-05, %v430_v15 }
 0x131   : > { %1372 = vrsqrt.f32 %v431_v16 }
 0x13e   : > { %v1373_v17 = vpop.eup %1372 }
 0x13f   : > { %v433_v19 = vmul.f32 %v1373_v17, %v425_v5 }
 0x141   : > { %v440_v21 = vmul.f32 %v1227_v18, %v433_v19 }
 0x143   : > { %v447_v22 = vadd.f32 %v1228_v20, %v440_v21 }
 0x145   : > { %v448_v23 = vpack.c.bf16 %v447_v22, %v447_v22 }
 0x147   : > { %1281 = vmatmul.mubr.msk.bf16.vlgmr.msra.gmra.mxu0 %vm419_vm0, %v448_v23 }
 0x148   : > { %1294 = vmatprep.mubr.msk.bf16.mxu0 %vm1399_vm1, %v1398_v9  ;;  %1293 = vmatpush3.bf16.xpose.msra.mxu0 %v617_v30 }
 0x149   : > { %1304 = vmatprep.subr.bf16.mxu0 %v1398_v9  ;;  %v600_v32 = vpop.permute.xlu1 %599 }
 0x14a   : > { %v1537_v33 = vpack.c.bf16 %v600_v32, %v600_v32 }
 0x14c   : > { %v663_v34 = vsel %vm612_vm2, %v1537_v33, 0 }
 0x14d   : > { %1299 = vmatpush3.bf16.xpose.msra.mxu1 %v663_v34  ;;  %v603_v36 = vpop.permute.xlu1 %602 }
 0x14e   : > { %1310 = vmatprep.subr.bf16.mxu1 %v1398_v9  ;;  %v1545_v37 = vpack.c.bf16 %v603_v36, %v603_v36 }
 0x150   : > { %v709_v42 = vsel %vm612_vm2, %v1545_v37, 0 }
 0x151   : > { %v606_v45 = vpop.permute.xlu1 %605 }
 0x152   : > { %v1553_v46 = vpack.c.bf16 %v606_v45, %v606_v45 }
 0x154   : > { %v755_v51 = vsel %vm612_vm2, %v1553_v46, 0 }
 0x207   : > { %v509_v38 = vpop.f32.mrf.mxu0 }
 0x208   : > { %v510_v39 = vadd.f32 %v1229_v35, %v509_v38 }
 0x209   : > { %v1282_v40 = vpop.f32.mrf.mxu0 }
 0x20a   : > { %v594_v41 = vpack.c.bf16 %v510_v39, %v510_v39  ;;  %588 = vrot.lane.b32.xlu1 %v510_v39, %s1401_s25  ;;  %585 = vrot.lane.b32.xlu0 %v510_v39, %s1400_s24 }
 0x20b   : > { %v512_v43 = vpop.f32.mrf.mxu0 }
 0x20c   : > { %1295 = vmatmul.mubr.msk.bf16.vlgmr.msra.gmra.mxu0 %vm612_vm2, %v594_v41 }
 0x20d   : > { %v1283_v44 = vpop.f32.mrf.mxu0  ;;  %1305 = vmatpush3.bf16.xpose.msra.mxu0 %v709_v42  ;;  %1306 = vmatprep.mubr.msk.bf16.mxu0 %vm1399_vm1, %v1398_v9 }
 0x20e   : > { %591 = vrot.lane.b32.xlu1 %v510_v39, %s1402_s26  ;;  %1316 = vmatprep.subr.bf16.mxu0 %v1398_v9 }
 0x27c   : > { %v589_v47 = vpop.permute.xlu1 %588  ;;  %v586_v48 = vpop.permute.xlu0 %585 }
 0x27d   : > { %v596_v49 = vpack.c.bf16 %v589_v47, %v589_v47  ;;  %v595_v50 = vpack.c.bf16 %v586_v48, %v586_v48 }
 0x27f   : > { %1301 = vmatmul.mubr.msk.bf16.vlgmr.msra.gmra.mxu1 %vm612_vm2, %v595_v50  ;;  %1307 = vmatmul.mubr.msk.bf16.vlgmr.msra.gmra.mxu0 %vm612_vm2, %v596_v49 }
 0x280   : > { %1311 = vmatpush3.bf16.xpose.msra.mxu1 %v755_v51  ;;  %1312 = vmatprep.mubr.msk.bf16.mxu1 %vm1399_vm1, %v1398_v9  ;;  %v592_v52 = vpop.permute.xlu1 %591 }
 0x281   : > { %1322 = vmatprep.subr.bf16.mxu1 %v1398_v9  ;;  %1318 = vmatprep.mubr.msk.bf16.mxu0 %vm1399_vm1, %v1398_v9  ;;  %v597_v53 = vpack.c.bf16 %v592_v52, %v592_v52 }
 0x287   : > { %1313 = vmatmul.mubr.msk.bf16.vlgmr.msra.gmra.mxu1 %vm612_vm2, %v597_v53 }
 0x288   : > { %1324 = vmatprep.mubr.msk.bf16.mxu1 %vm1399_vm1, %v1398_v9 }
 0x2cc   : > { %v653_v61 = vpop.f32.mrf.mxu0 }
 0x2cd   : > { %v797_v62 = vmul.f32 0.35355338, %v653_v61 }
 0x2ce   : > { %v1296_v63 = vpop.f32.mrf.mxu0 }
 0x2cf   : > { %v807_v0 = vadd.f32 %v805_v60, %v797_v62 }
 0x2d0   : > { %v656_v2 = vpop.f32.mrf.mxu0 }
 0x2d1   : > { %v811_v3 = vsel %vm612_vm2, %v807_v0, -inf }
 0x2d2   : > { %812 = vmax.xlane.f32.xlu1 %v811_v3  ;;  %v1297_v4 = vpop.f32.mrf.mxu0 }
 0x33f   : > { %v699_v5 = vpop.f32.mrf.mxu1  ;;  %v745_v6 = vpop.f32.mrf.mxu0 }
 0x340   : > { %v798_v7 = vmul.f32 0.35355338, %v699_v5  ;;  %v799_v8 = vmul.f32 0.35355338, %v745_v6 }
 0x341   : > { %v1302_v10 = vpop.f32.mrf.mxu1  ;;  %v1308_v11 = vpop.f32.mrf.mxu0 }
 0x342   : > { %v808_v12 = vadd.f32 %v805_v60, %v798_v7  ;;  %v809_v13 = vadd.f32 %v805_v60, %v799_v8 }
 0x343   : > { %v702_v14 = vpop.f32.mrf.mxu1  ;;  %v748_v15 = vpop.f32.mrf.mxu0 }
 0x344   : > { %v814_v16 = vsel %vm612_vm2, %v808_v12, -inf  ;;  %v817_v17 = vsel %vm612_vm2, %v809_v13, -inf  ;;  %v1371_v14 = vld [vmem:[%s1633_s9] sm:$0xff]  }
 0x345   : > { %815 = vmax.xlane.f32.xlu0 %v814_v16  ;;  %v1303_v18 = vpop.f32.mrf.mxu1  ;;  %818 = vmax.xlane.f32.xlu1 %v817_v17  ;;  %v1309_v19 = vpop.f32.mrf.mxu0 }
 0x347   : > { %v791_v20 = vpop.f32.mrf.mxu1 }
 0x348   : > { %v800_v21 = vmul.f32 0.35355338, %v791_v20 }
 0x349   : > { %v1314_v22 = vpop.f32.mrf.mxu1 }
 0x34a   : > { %v810_v23 = vadd.f32 %v805_v60, %v800_v21 }
 0x34b   : > { %v794_v24 = vpop.f32.mrf.mxu1 }
 0x34c   : > { %v820_v25 = vsel %vm612_vm2, %v810_v23, -inf }
 0x34d   : > { %v1315_v26 = vpop.f32.mrf.mxu1  ;;  %821 = vmax.xlane.f32.xlu1 %v820_v25 }
 0x35b   : > { %860 = vrot.lane.b32.xlu0 %v1532_v28, %s1404_s18  ;;  %v813_v27 = vpop.xlane.xlu1 %812 }
 0x35c   : > { %v823_v29 = vsub.f32 %v807_v0, %v813_v27 }
 0x35e   : > { %910 = vrot.lane.b32.xlu1 %v1537_v33, %s1404_s18  ;;  %v827_v30 = vmul.f32 1.442695, %v823_v29 }
 0x360   : > { %1374 = vpow2.f32 %v827_v30 }
 0x36d   : > { %v1375_v31 = vpop.eup %1374 }
 0x36e   : > { %v835_v32 = vsel %vm612_vm2, %v1375_v31, 0.0 }
 0x37a   : > { %836 = vadd.xlane.f32.xlu0 %v835_v32 }
 0x3ce   : > { %v816_v34 = vpop.xlane.xlu0 %815  ;;  %v819_v35 = vpop.xlane.xlu1 %818 }
 0x3cf   : > { %v824_v36 = vsub.f32 %v808_v12, %v816_v34  ;;  %v825_v38 = vsub.f32 %v809_v13, %v819_v35  ;;  %v1370_v13 = vld [vmem:[%s1633_s9 + $0x8] sm:$0xff]  }
 0x3d1   : > { %v829_v39 = vmul.f32 1.442695, %v824_v36  ;;  %v831_v40 = vmul.f32 1.442695, %v825_v38  ;;  %v1248_v36 = vld [vmem:[%s1634_s10] ss:$0 sm:$0xff] }
 0x3d2   : > { %v861_v41 = vpop.permute.xlu0 %860 }
 0x3d3   : > { %1376 = vpow2.f32 %v829_v39  ;;  %v867_v28 = vsel %vm865_vm4, %v861_v41, 0 }
 0x3d4   : > { %1378 = vpow2.f32 %v831_v40  ;;  %1317 = vmatpush3.bf16.msra.mxu0 %v867_v28 }
 0x3d5   : > { %1328 = vmatprep.subr.bf16.mxu0 %v1398_v9 }
 0x3d6   : > { %v822_v33 = vpop.xlane.xlu1 %821 }
 0x3d7   : > { %v826_v42 = vsub.f32 %v810_v23, %v822_v33 }
 0x3d9   : > { %v833_v43 = vmul.f32 1.442695, %v826_v42 }
 0x3da   : > { %v911_v44 = vpop.permute.xlu1 %910 }
 0x3db   : > { %1380 = vpow2.f32 %v833_v43  ;;  %v916_v45 = vsel %vm865_vm4, %v911_v44, 0 }
 0x3dc   : > { %1323 = vmatpush3.bf16.msra.mxu1 %v916_v45 }
 0x3dd   : > { %1334 = vmatprep.subr.bf16.mxu1 %v1398_v9 }
 0x3e0   : > { %v1377_v47 = vpop.eup %1376 }
 0x3e1   : > { %v1379_v48 = vpop.eup %1378  ;;  %v838_v49 = vsel %vm612_vm2, %v1377_v47, 0.0 }
 0x3e2   : > { %839 = vadd.xlane.f32.xlu1 %v838_v49  ;;  %v841_v50 = vsel %vm612_vm2, %v1379_v48, 0.0 }
 0x3e3   : > { %842 = vadd.xlane.f32.xlu0 %v841_v50 }
 0x3e8   : > { %v1381_v51 = vpop.eup %1380 }
 0x3e9   : > { %v844_v52 = vsel %vm612_vm2, %v1381_v51, 0.0 }
 0x3ea   : > { %845 = vadd.xlane.f32.xlu1 %v844_v52 }
 0x3f9   : > { %1008 = vrot.lane.b32.xlu0 %v1553_v46, %s1404_s18 }
 0x3fb   : > { %959 = vrot.lane.b32.xlu1 %v1545_v37, %s1404_s18 }
 0x403   : > { %v837_v53 = vpop.xlane.xlu0 %836 }
 0x404   : > { %1382 = vrcp.f32 %v837_v53 }
 0x411   : > { %v1383_v54 = vpop.eup %1382 }
 0x412   : > { %v851_v55 = vmul.f32 %v1383_v54, %v1375_v31 }
 0x414   : > { %v855_v56 = vpack.c.bf16 %v851_v55, %v851_v55 }
 0x416   : > { %1319 = vmatmul.mubr.msk.bf16.vlgmr.msra.gmra.mxu0 %vm612_vm2, %v855_v56 }
 0x417   : > { %1330 = vmatprep.mubr.msk.bf16.mxu0 %vm1399_vm1, %v1398_v9 }
 0x46b   : > { %v840_v57 = vpop.xlane.xlu1 %839 }
 0x46c   : > { %v843_v58 = vpop.xlane.xlu0 %842  ;;  %1384 = vrcp.f32 %v840_v57 }
 0x46d   : > { %1386 = vrcp.f32 %v843_v58 }
 0x470   : > { %v1009_v63 = vpop.permute.xlu0 %1008 }
 0x471   : > { %v1014_v4 = vsel %vm865_vm4, %v1009_v63, 0 }
 0x473   : > { %v846_v59 = vpop.xlane.xlu1 %845 }
 0x474   : > { %1388 = vrcp.f32 %v846_v59 }
 0x477   : > { %v960_v46 = vpop.permute.xlu1 %959 }
 0x478   : > { %v965_v60 = vsel %vm865_vm4, %v960_v46, 0 }
 0x479   : > { %v1385_v37 = vpop.eup %1384  ;;  %1329 = vmatpush3.bf16.msra.mxu0 %v965_v60 }
 0x47a   : > { %v1387_v61 = vpop.eup %1386  ;;  %v852_v62 = vmul.f32 %v1385_v37, %v1377_v47  ;;  %1340 = vmatprep.subr.bf16.mxu0 %v1398_v9 }
 0x47b   : > { %v853_v0 = vmul.f32 %v1387_v61, %v1379_v48 }
 0x47c   : > { %v856_v2 = vpack.c.bf16 %v852_v62, %v852_v62 }
 0x47d   : > { %v857_v3 = vpack.c.bf16 %v853_v0, %v853_v0 }
 0x47e   : > { %1325 = vmatmul.mubr.msk.bf16.vlgmr.msra.gmra.mxu1 %vm612_vm2, %v856_v2 }
 0x47f   : > { %1331 = vmatmul.mubr.msk.bf16.vlgmr.msra.gmra.mxu0 %vm612_vm2, %v857_v3  ;;  %1335 = vmatpush3.bf16.msra.mxu1 %v1014_v4 }
 0x480   : > { %1336 = vmatprep.mubr.msk.bf16.mxu1 %vm1399_vm1, %v1398_v9  ;;  %1344 = vmatprep.mubr.msk.bf16.mxu0 %vm1399_vm1, %v1398_v9 }
 0x481   : > { %v1389_v5 = vpop.eup %1388  ;;  %1341 = vmatpush3.bf16.msra.mxu0 %v1370_v13 }
 0x482   : > { %v854_v6 = vmul.f32 %v1389_v5, %v1381_v51  ;;  %1342 = vmatprep.subr.bf16.mxu0 %v1398_v9 }
 0x484   : > { %v858_v7 = vpack.c.bf16 %v854_v6, %v854_v6 }
 0x485   : > { %1343 = vmatpush3.bf16.msra.mxu0 %v1371_v14 }
 0x486   : > { %1337 = vmatmul.mubr.msk.bf16.vlgmr.msra.gmra.mxu1 %vm612_vm2, %v858_v7 }
 0x4d6   : > { %v903_v8 = vpop.f32.mrf.mxu0 }
 0x4d8   : > { %v1320_v10 = vpop.f32.mrf.mxu0 }
 0x4da   : > { %v906_v11 = vpop.f32.mrf.mxu0 }
 0x4dc   : > { %v1321_v12 = vpop.f32.mrf.mxu0 }
 0x53e   : > { %v952_v15 = vpop.f32.mrf.mxu1 }
 0x53f   : > { %v1001_v16 = vpop.f32.mrf.mxu0  ;;  %1057 = vrot.lane.b32.xlu1 %v952_v15, %s1405_s20 }
 0x540   : > { %1061 = vrot.lane.b32.xlu0 %v1001_v16, %s1406_s21  ;;  %v1326_v17 = vpop.f32.mrf.mxu1 }
 0x541   : > { %v1332_v18 = vpop.f32.mrf.mxu0 }
 0x542   : > { %v955_v19 = vpop.f32.mrf.mxu1 }
 0x543   : > { %v1004_v20 = vpop.f32.mrf.mxu0 }
 0x544   : > { %v1327_v21 = vpop.f32.mrf.mxu1 }
 0x545   : > { %v1333_v22 = vpop.f32.mrf.mxu0 }
 0x546   : > { %v1050_v23 = vpop.f32.mrf.mxu1 }
 0x547   : > { %1065 = vrot.lane.b32.xlu1 %v1050_v23, %s1407_s22 }
 0x548   : > { %v1338_v24 = vpop.f32.mrf.mxu1 }
 0x54a   : > { %v1053_v25 = vpop.f32.mrf.mxu1 }
 0x54c   : > { %v1339_v26 = vpop.f32.mrf.mxu1 }
 0x5b1   : > { %v1058_v9 = vpop.permute.xlu1 %1057 }
 0x5b2   : > { %v1068_v27 = vsel %vm612_vm2, %v903_v8, %v1058_v9  ;;  %v1062_v29 = vpop.permute.xlu0 %1061 }
 0x5b3   : > { %v1070_v30 = vsel %vm1069_vm5, %v1068_v27, %v1062_v29 }
 0x5b9   : > { %v1066_v31 = vpop.permute.xlu1 %1065 }
 0x5ba   : > { %v1072_v32 = vsel %vm1071_vm6, %v1070_v30, %v1066_v31 }
 0x5bb   : > { %v1073_v34 = vpack.c.bf16 %v1072_v32, %v1072_v32 }
 0x5bd   : > { %1345 = vmatmul.mubr.msk.bf16.vlgmr.msra.gmra.mxu0 %vm419_vm0, %v1073_v34 }
 0x67d   : > { %v1127_v35 = vpop.f32.mrf.mxu0 }
 0x67e   : > { %v1133_v38 = vadd.f32 %v1127_v35, %v1485_v1 }
 0x67f   : > { %v1346_v39 = vpop.f32.mrf.mxu0 }
 0x680   : > { %v1141_v40 = vadd.f32 %v1248_v36, %v1133_v38 }
 0x681   : > { %v1130_v41 = vpop.f32.mrf.mxu0 }
 0x682   : > { %v1142_v28 = vpack.c.bf16 %v1141_v40, %v1141_v40 }
 0x683   : > { %v1347_v33 = vpop.f32.mrf.mxu0 }
 0x684   : > { %1144 = vst.msk [vmem:[%s412_s27] sm:$0xf] %vm1143_vm7, %v1142_v28 }
 0x685 PF: > { %s21_s17 = sadd.s32 1, %s1396_s17  }
 0x686   : > { %p18_p4 = scmp.ge.s32.totalorder %s21_s17, 4  }
 0x688   :  { %20 = sbr.rel (!%p18_p4) target bundleno = 1 (0x1), region = 100 }

</bundles_post_ra>
